<compile_context>
chip_gen: v6e
topology: v6e:2x2x1
jax: 0.10.0
libtpu: 0.0.40
codegen_flags: <defaults>
</compile_context>

<pallas_src>
import jax
import jax.numpy as jnp
from jax.experimental import pallas as pl
from jax.experimental.pallas import tpu as pltpu

# ----------------------------- configuration -------------------------------
H_IMG = 16                      # image height
W_IMG = 16                      # image width
N_RAYS = H_IMG * W_IMG          # 256 rays (2 dense lane-groups of 128)
N_SAMPLES = 8                   # samples per ray
SN = N_SAMPLES * N_RAYS         # 2048 points per batch element
N_FREQ = 4                      # positional-encoding frequencies
Z_DIM = 32                      # latent code dim
D_PE = 3 * 2 * N_FREQ           # 24 positional-encoding features
HIDDEN = 64
OUT_ROWS = 8                    # rgb(3) + sigma(1) + 4 zero-pad rows
DEPTH_NEAR = 0.1
DEPTH_FAR = 2.0
DELTA = (DEPTH_FAR - DEPTH_NEAR) / (N_SAMPLES - 1)   # sample spacing
MAX_B_TILE = 4                  # batch elements per grid step (VMEM-safe on v5e/v7x)


def _choose_b_tile(b):
    """Largest per-step batch tile that divides b, preferring an even grid
    (so both v7x TensorCores get work under dimension_semantics=('parallel',))."""
    if b <= 2:
        return 1
    for tile in range(min(MAX_B_TILE, b // 2), 0, -1):
        if b % tile == 0 and (b // tile) % 2 == 0:
            return tile
    for tile in range(min(MAX_B_TILE, b), 0, -1):
        if b % tile == 0:
            return tile
    return 1


# ------------------------------ Pallas kernel ------------------------------
def _nerf_gen_kernel(pe_ref, z_ref, w1z_ref, w2_ref, b2_ref, w3_ref, b3_ref,
                     rgb_ref):
    """Fused NeRF MLP + volume rendering for B_TILE batch elements.

    pe_ref : (HIDDEN, SN)      f32  batch-invariant layer-1 PE term (+ b1 folded)
    z_ref  : (Z_DIM, B_TILE)   f32  per-element latent codes (columns)
    w1z    : (HIDDEN, Z_DIM)   f32  layer-1 latent weights
    w2     : (HIDDEN, HIDDEN)  bf16
    b2     : (HIDDEN, 1)       f32
    w3     : (OUT_ROWS, HIDDEN) bf16 (rows 0..2 rgb, row 3 sigma, rest zero)
    b3     : (OUT_ROWS, 1)     f32
    rgb_ref: (B_TILE, 3, N_RAYS) f32 composited rgb (lane-dense)
    """
    n = N_RAYS
    b_tile = z_ref.shape[-1]

    # Hoisted loads (once per grid step).
    pe_b1 = pe_ref[...]                                     # (HIDDEN, SN) f32
    w2 = w2_ref[...]
    w3 = w3_ref[...]
    b2 = b2_ref[...]
    b3 = b3_ref[...]

    # Layer-1 latent contribution for all tile elements in one tiny matmul.
    zc = jnp.dot(w1z_ref[...], z_ref[...],
                 preferred_element_type=jnp.float32)        # (HIDDEN, B_TILE)

    for bt in range(b_tile):                                # static unroll
        # --- MLP (rays*samples on the lane axis; lane-dense MXU matmuls) ---
        h = jnp.maximum(pe_b1 + zc[:, bt:bt + 1], 0.0)      # (HIDDEN, SN) f32
        h = h.astype(jnp.bfloat16)
        h = jnp.dot(w2, h, preferred_element_type=jnp.float32)
        h = jnp.maximum(h + b2, 0.0).astype(jnp.bfloat16)   # (HIDDEN, SN)
        out = jnp.dot(w3, h, preferred_element_type=jnp.float32) + b3
        # out: (OUT_ROWS, SN); rows 0..2 = rgb logits, row 3 = density logit.

        # Head nonlinearities over all samples at once (batched EUP work).
        rgb_all = jax.nn.sigmoid(out[0:3, :])               # (3, SN)
        sigma_all = jax.nn.softplus(out[3:4, :])            # (1, SN)
        # alpha = 1 - exp(-sigma*DELTA) = 2*tanh(x/2)/(1+tanh(x/2));
        # tanh and the reciprocal both run on the EUP slot.
        t = jnp.tanh(0.5 * DELTA * sigma_all)
        alpha_all = (2.0 * t) * pl.reciprocal(1.0 + t, approx=True)

        # --- volume rendering: alpha compositing along the sample axis -----
        trans = jnp.ones((1, n), jnp.float32)
        rgb_acc = jnp.zeros((3, n), jnp.float32)
        for s in range(N_SAMPLES):                          # static unroll
            lo = s * n                                      # 128-aligned slice
            alpha = alpha_all[:, lo:lo + n]                 # (1, N)
            w = trans * alpha
            rgb_acc = rgb_acc + w * rgb_all[:, lo:lo + n]
            trans = trans * (1.0 - alpha)

        rgb_ref[bt] = rgb_acc                               # lane-dense store


def _nerf_generator_call(pe_b1, z_g, params):
    """pe_b1: (HIDDEN, SN) f32; z_g: (G, Z_DIM, B_TILE) f32 -> (B, 3, N_RAYS)."""
    g, _, b_tile = z_g.shape
    b = g * b_tile
    w1z, w2, b2, w3, b3 = params

    flops = 2 * b * SN * (HIDDEN * HIDDEN + HIDDEN * OUT_ROWS)   # MXU
    flops += b * (2 * HIDDEN * Z_DIM + SN * (2 * HIDDEN + 40))   # VPU add/relu/compose
    transcendentals = b * SN * 5                                 # sigmoid/softplus/tanh/rcp
    bytes_accessed = (HIDDEN * SN * 4                            # pe term (fetched once)
                      + 2 * (HIDDEN * HIDDEN + OUT_ROWS * HIDDEN)
                      + 4 * (HIDDEN * Z_DIM + HIDDEN + OUT_ROWS)
                      + b * Z_DIM * 4                            # latents
                      + b * 3 * N_RAYS * 4)                      # rgb output

    return pl.pallas_call(
        _nerf_gen_kernel,
        out_shape=jax.ShapeDtypeStruct((b, 3, N_RAYS), jnp.float32),
        grid_spec=pltpu.PrefetchScalarGridSpec(
            num_scalar_prefetch=0,
            grid=(g,),
            in_specs=[
                # Constant block index -> fetched once, never re-DMA'd.
                pl.BlockSpec((HIDDEN, SN), lambda i: (0, 0)),            # pe_b1
                pl.BlockSpec((None, Z_DIM, b_tile), lambda i: (i, 0, 0)),  # z
                pl.BlockSpec((HIDDEN, Z_DIM), lambda i: (0, 0)),         # w1z
                pl.BlockSpec((HIDDEN, HIDDEN), lambda i: (0, 0)),        # w2
                pl.BlockSpec((HIDDEN, 1), lambda i: (0, 0)),             # b2
                pl.BlockSpec((OUT_ROWS, HIDDEN), lambda i: (0, 0)),      # w3
                pl.BlockSpec((OUT_ROWS, 1), lambda i: (0, 0)),           # b3
            ],
            out_specs=pl.BlockSpec((b_tile, 3, N_RAYS), lambda i: (i, 0, 0)),
        ),
        compiler_params=pltpu.CompilerParams(
            dimension_semantics=("parallel",)),      # both v7x TCs when grid even
        cost_estimate=pl.CostEstimate(
            flops=int(flops),
            transcendentals=int(transcendentals),
            bytes_accessed=int(bytes_accessed)),
    )(pe_b1, z_g, w1z, w2, b2, w3, b3)


# ------------------------- generator (JAX glue) -----------------------------
def _positional_encoding(p):
    """p: (..., 3) -> (..., 3*2*N_FREQ)."""
    freqs = 2.0 ** jnp.arange(N_FREQ, dtype=jnp.float32) * jnp.pi
    ang = p[..., None, :] * freqs[:, None]                   # (..., F, 3)
    enc = jnp.concatenate([jnp.sin(ang), jnp.cos(ang)], axis=-1)
    return enc.reshape(*p.shape[:-1], D_PE)


def _generate(params, pe_b1, z):
    """pe_b1: (HIDDEN, SN) precomputed layer-1 PE term; z: (B, Z_DIM)."""
    b = z.shape[0]
    b_tile = _choose_b_tile(b)
    g = b // b_tile
    # (G, Z_DIM, B_TILE): latent columns, grouped per grid step (tiny reshape).
    z_g = z.reshape(g, b_tile, Z_DIM).transpose(0, 2, 1)
    rgb = _nerf_generator_call(pe_b1, z_g, params)           # (B, 3, N_RAYS)
    # Ray index is row-major over (H, W), so this is already NCHW.
    return rgb.reshape(b, 3, H_IMG, W_IMG)


_generate_jit = jax.jit(_generate)


class NerfGenerator:
    """Small synthetic NeRF-style generator producing (B, 3, H, W) images."""

    def __init__(self, key):
        k1, k2, k3, self._zkey = jax.random.split(key, 4)
        scale = 0.1

        # Layer-1 weights split into PE part (hoisted) and latent part.
        w1 = scale * jax.random.normal(k1, (HIDDEN, D_PE + Z_DIM), jnp.float32)
        w1_pe = w1[:, :D_PE]                                  # (HIDDEN, D_PE)
        w1_z = w1[:, D_PE:]                                   # (HIDDEN, Z_DIM)
        b1 = jnp.zeros((HIDDEN, 1), jnp.float32)

        w2 = scale * jax.random.normal(k2, (HIDDEN, HIDDEN), jnp.float32)
        w3 = jnp.zeros((OUT_ROWS, HIDDEN), jnp.float32)
        w3 = w3.at[:4, :].set(
            scale * jax.random.normal(k3, (4, HIDDEN), jnp.float32))

        self.params = (
            w1_z,                                             # f32 (tiny matmul)
            w2.astype(jnp.bfloat16),
            jnp.zeros((HIDDEN, 1), jnp.float32),
            w3.astype(jnp.bfloat16),
            jnp.zeros((OUT_ROWS, 1), jnp.float32),
        )

        # Fixed ray grid (orthographic rays along +z through the pixel grid).
        ys = jnp.linspace(-1.0, 1.0, H_IMG)
        xs = jnp.linspace(-1.0, 1.0, W_IMG)
        gy, gx = jnp.meshgrid(ys, xs, indexing="ij")
        origins = jnp.stack([gx, gy, jnp.zeros_like(gx)], -1).reshape(N_RAYS, 3)
        depths = jnp.linspace(DEPTH_NEAR, DEPTH_FAR, N_SAMPLES)       # (S,)
        direction = jnp.array([0.0, 0.0, 1.0], jnp.float32)
        pts = origins[None, :, :] + depths[:, None, None] * direction  # (S,N,3)
        pe = _positional_encoding(pts)                                 # (S,N,24)
        pe_t = jnp.transpose(pe, (2, 0, 1)).reshape(D_PE, SN)          # (24, SN)

        # Batch-independent layer-1 PE term with b1 folded in, computed ONCE.
        self._pe_b1 = (w1_pe @ pe_t + b1).astype(jnp.float32)          # (HIDDEN, SN)

    def __call__(self, batch_size=2, **kwargs):
        # Deterministic latent codes.
        z = jax.random.normal(self._zkey, (batch_size, Z_DIM), jnp.float32)
        return _generate_jit(self.params, self._pe_b1, z)     # (B, 3, H, W)


# ------------------------------- HEADNERF -----------------------------------
class HEADNERF:
    """JAX/Pallas port of the HEADNERF container module."""

    def __init__(self, device=None, discriminator=None, generator=None,
                 generator_test=None, **kwargs):
        self.discriminator = discriminator    # unused in forward
        self.generator = generator
        self.generator_test = generator_test
        self._device = device

    def forward(self, batch_size, **kwargs):
        gen = self.generator_test
        if gen is None:
            gen = self.generator
        return gen(batch_size=batch_size)

    def __call__(self, batch_size, **kwargs):
        return self.forward(batch_size, **kwargs)

    def generate_test_images(self):
        gen = self.generator_test
        if gen is None:
            gen = self.generator
        return gen()

    def to(self, device):
        self._device = device
        return self


# --------------------------------- main --------------------------------------
if __name__ == "__main__":
    key = jax.random.PRNGKey(0)
    generator = NerfGenerator(key)
    model = HEADNERF(generator=generator)

    batch_size = 2
    imgs = model(batch_size=batch_size)
    imgs = jax.block_until_ready(imgs)

    assert imgs.shape == (batch_size, 3, H_IMG, W_IMG), imgs.shape
    assert imgs.dtype == jnp.float32
    assert bool(jnp.all(jnp.isfinite(imgs)))
    print("KERNEL_OK")
</pallas_src>

<mosaic_0001>
module attributes {stable_mosaic.version = 11 : i64} {
  func.func @_nerf_gen_kernel(%arg0: i32, %arg1: memref<64x2048xf32, #tpu.memory_space<vmem>>, %arg2: memref<1x32x1xf32, #tpu.memory_space<vmem>>, %arg3: memref<64x32xf32, #tpu.memory_space<vmem>>, %arg4: memref<64x64xbf16, #tpu.memory_space<vmem>>, %arg5: memref<64x1xf32, #tpu.memory_space<vmem>>, %arg6: memref<8x64xbf16, #tpu.memory_space<vmem>>, %arg7: memref<8x1xf32, #tpu.memory_space<vmem>>, %arg8: memref<1x3x256xf32, #tpu.memory_space<vmem>>) attributes {dimension_semantics = [#tpu.dimension_semantics<parallel>], iteration_bounds = array<i64: 2>, scalar_prefetch = 0 : i64, scratch_operands = 0 : i64, tpu.core_type = #tpu.core_type<tc>, window_params = [{pipeline_mode = #tpu.pipeline_mode<synchronous>, transform_indices = @transform_0, window_bounds = array<i64: 64, 2048>}, {transform_indices = @transform_1, window_bounds = array<i64: 1, 32, 1>}, {pipeline_mode = #tpu.pipeline_mode<synchronous>, transform_indices = @transform_2, window_bounds = array<i64: 64, 32>}, {pipeline_mode = #tpu.pipeline_mode<synchronous>, transform_indices = @transform_3, window_bounds = array<i64: 64, 64>}, {pipeline_mode = #tpu.pipeline_mode<synchronous>, transform_indices = @transform_4, window_bounds = array<i64: 64, 1>}, {pipeline_mode = #tpu.pipeline_mode<synchronous>, transform_indices = @transform_5, window_bounds = array<i64: 8, 64>}, {pipeline_mode = #tpu.pipeline_mode<synchronous>, transform_indices = @transform_6, window_bounds = array<i64: 8, 1>}, {transform_indices = @transform_7, window_bounds = array<i64: 1, 3, 256>}]} {
    %c0 = arith.constant 0 : index
    %c0_0 = arith.constant 0 : index
    %0 = vector.load %arg1[%c0, %c0_0] : memref<64x2048xf32, #tpu.memory_space<vmem>>, vector<64x2048xf32>
    %c0_1 = arith.constant 0 : index
    %c0_2 = arith.constant 0 : index
    %1 = vector.load %arg4[%c0_1, %c0_2] : memref<64x64xbf16, #tpu.memory_space<vmem>>, vector<64x64xbf16>
    %c0_3 = arith.constant 0 : index
    %c0_4 = arith.constant 0 : index
    %2 = vector.load %arg6[%c0_3, %c0_4] : memref<8x64xbf16, #tpu.memory_space<vmem>>, vector<8x64xbf16>
    %c0_5 = arith.constant 0 : index
    %c0_6 = arith.constant 0 : index
    %3 = vector.load %arg5[%c0_5, %c0_6] : memref<64x1xf32, #tpu.memory_space<vmem>>, vector<64x1xf32>
    %c0_7 = arith.constant 0 : index
    %c0_8 = arith.constant 0 : index
    %4 = vector.load %arg7[%c0_7, %c0_8] : memref<8x1xf32, #tpu.memory_space<vmem>>, vector<8x1xf32>
    %c0_9 = arith.constant 0 : index
    %c0_10 = arith.constant 0 : index
    %5 = vector.load %arg3[%c0_9, %c0_10] : memref<64x32xf32, #tpu.memory_space<vmem>>, vector<64x32xf32>
    %c0_11 = arith.constant 0 : index
    %c0_12 = arith.constant 0 : index
    %c0_13 = arith.constant 0 : index
    %6 = vector.load %arg2[%c0_11, %c0_12, %c0_13] : memref<1x32x1xf32, #tpu.memory_space<vmem>>, vector<1x32x1xf32>
    %7 = vector.shape_cast %6 : vector<1x32x1xf32> to vector<32x1xf32>
    %cst = arith.constant dense<0.000000e+00> : vector<64x1xf32>
    %8 = tpu.matmul %5, %7, %cst {dimension_numbers = #tpu.dot_dimension_numbers<[1], [0], [0], [1], [0, 0, 1, 1], [], []>} : vector<64x32xf32>, vector<32x1xf32>, vector<64x1xf32> -> vector<64x1xf32>
    %9 = vector.broadcast %8 : vector<64x1xf32> to vector<64x2048xf32>
    %10 = arith.addf %0, %9 : vector<64x2048xf32>
    %cst_14 = arith.constant 0.000000e+00 : f32
    %11 = vector.broadcast %cst_14 : f32 to vector<64x2048xf32>
    %12 = arith.maximumf %10, %11 : vector<64x2048xf32>
    %13 = arith.truncf %12 : vector<64x2048xf32> to vector<64x2048xbf16>
    %cst_15 = arith.constant dense<0.000000e+00> : vector<64x2048xf32>
    %14 = tpu.matmul %1, %13, %cst_15 {dimension_numbers = #tpu.dot_dimension_numbers<[1], [0], [0], [1], [0, 0, 1, 1], [], []>} : vector<64x64xbf16>, vector<64x2048xbf16>, vector<64x2048xf32> -> vector<64x2048xf32>
    %15 = vector.broadcast %3 : vector<64x1xf32> to vector<64x2048xf32>
    %16 = arith.addf %14, %15 : vector<64x2048xf32>
    %cst_16 = arith.constant 0.000000e+00 : f32
    %17 = vector.broadcast %cst_16 : f32 to vector<64x2048xf32>
    %18 = arith.maximumf %16, %17 : vector<64x2048xf32>
    %19 = arith.truncf %18 : vector<64x2048xf32> to vector<64x2048xbf16>
    %cst_17 = arith.constant dense<0.000000e+00> : vector<8x2048xf32>
    %20 = tpu.matmul %2, %19, %cst_17 {dimension_numbers = #tpu.dot_dimension_numbers<[1], [0], [0], [1], [0, 0, 1, 1], [], []>} : vector<8x64xbf16>, vector<64x2048xbf16>, vector<8x2048xf32> -> vector<8x2048xf32>
    %21 = vector.broadcast %4 : vector<8x1xf32> to vector<8x2048xf32>
    %22 = arith.addf %20, %21 : vector<8x2048xf32>
    %23 = vector.extract_strided_slice %22 {offsets = [0, 0], sizes = [3, 2048], strides = [1, 1]} : vector<8x2048xf32> to vector<3x2048xf32>
    %24 = arith.negf %23 : vector<3x2048xf32>
    %25 = math.exp %24 : vector<3x2048xf32>
    %cst_18 = arith.constant 1.000000e+00 : f32
    %26 = vector.broadcast %cst_18 : f32 to vector<3x2048xf32>
    %27 = arith.addf %26, %25 : vector<3x2048xf32>
    %28 = arith.divf %26, %27 : vector<3x2048xf32>
    %29 = vector.extract_strided_slice %22 {offsets = [3, 0], sizes = [1, 2048], strides = [1, 1]} : vector<8x2048xf32> to vector<1x2048xf32>
    %cst_19 = arith.constant 0.000000e+00 : f32
    %30 = vector.broadcast %cst_19 : f32 to vector<1x2048xf32>
    %31 = arith.maximumf %29, %30 : vector<1x2048xf32>
    %32 = vector.broadcast %cst_19 : f32 to vector<1x2048xf32>
    %33 = arith.subf %29, %32 : vector<1x2048xf32>
    %34 = arith.cmpf one, %33, %33 : vector<1x2048xf32>
    %35 = vector.broadcast %cst_19 : f32 to vector<1x2048xf32>
    %36 = arith.addf %29, %35 : vector<1x2048xf32>
    %37 = math.absf %33 : vector<1x2048xf32>
    %cst_20 = arith.constant 0.000000e+00 : f32
    %38 = vector.broadcast %cst_20 : f32 to vector<1x2048xf32>
    %39 = arith.subf %38, %37 : vector<1x2048xf32>
    %40 = math.exp %39 : vector<1x2048xf32>
    %41 = math.log1p %40 : vector<1x2048xf32>
    %42 = arith.addf %31, %41 : vector<1x2048xf32>
    %43 = arith.select %34, %36, %42 : vector<1x2048xi1>, vector<1x2048xf32>
    %cst_21 = arith.constant 0.135714293 : f32
    %44 = vector.broadcast %cst_21 : f32 to vector<1x2048xf32>
    %45 = arith.mulf %44, %43 : vector<1x2048xf32>
    %46 = math.tanh %45 : vector<1x2048xf32>
    %cst_22 = arith.constant 2.000000e+00 : f32
    %47 = vector.broadcast %cst_22 : f32 to vector<1x2048xf32>
    %48 = arith.mulf %47, %46 : vector<1x2048xf32>
    %cst_23 = arith.constant 1.000000e+00 : f32
    %49 = vector.broadcast %cst_23 : f32 to vector<1x2048xf32>
    %50 = arith.addf %49, %46 : vector<1x2048xf32>
    %51 = tpu.reciprocal %50 {approx = true} : vector<1x2048xf32> -> vector<1x2048xf32>
    %52 = arith.mulf %48, %51 : vector<1x2048xf32>
    %cst_24 = arith.constant 1.000000e+00 : f32
    %53 = vector.broadcast %cst_24 : f32 to vector<1x256xf32>
    %cst_25 = arith.constant 0.000000e+00 : f32
    %54 = vector.broadcast %cst_25 : f32 to vector<3x256xf32>
    %55 = vector.extract_strided_slice %52 {offsets = [0, 0], sizes = [1, 256], strides = [1, 1]} : vector<1x2048xf32> to vector<1x256xf32>
    %56 = arith.mulf %53, %55 : vector<1x256xf32>
    %57 = vector.extract_strided_slice %28 {offsets = [0, 0], sizes = [3, 256], strides = [1, 1]} : vector<3x2048xf32> to vector<3x256xf32>
    %58 = vector.broadcast %56 : vector<1x256xf32> to vector<3x256xf32>
    %59 = arith.mulf %58, %57 : vector<3x256xf32>
    %60 = arith.addf %54, %59 : vector<3x256xf32>
    %cst_26 = arith.constant 1.000000e+00 : f32
    %61 = vector.broadcast %cst_26 : f32 to vector<1x256xf32>
    %62 = arith.subf %61, %55 : vector<1x256xf32>
    %63 = arith.mulf %53, %62 : vector<1x256xf32>
    %64 = vector.extract_strided_slice %52 {offsets = [0, 256], sizes = [1, 256], strides = [1, 1]} : vector<1x2048xf32> to vector<1x256xf32>
    %65 = arith.mulf %63, %64 : vector<1x256xf32>
    %66 = vector.extract_strided_slice %28 {offsets = [0, 256], sizes = [3, 256], strides = [1, 1]} : vector<3x2048xf32> to vector<3x256xf32>
    %67 = vector.broadcast %65 : vector<1x256xf32> to vector<3x256xf32>
    %68 = arith.mulf %67, %66 : vector<3x256xf32>
    %69 = arith.addf %60, %68 : vector<3x256xf32>
    %cst_27 = arith.constant 1.000000e+00 : f32
    %70 = vector.broadcast %cst_27 : f32 to vector<1x256xf32>
    %71 = arith.subf %70, %64 : vector<1x256xf32>
    %72 = arith.mulf %63, %71 : vector<1x256xf32>
    %73 = vector.extract_strided_slice %52 {offsets = [0, 512], sizes = [1, 256], strides = [1, 1]} : vector<1x2048xf32> to vector<1x256xf32>
    %74 = arith.mulf %72, %73 : vector<1x256xf32>
    %75 = vector.extract_strided_slice %28 {offsets = [0, 512], sizes = [3, 256], strides = [1, 1]} : vector<3x2048xf32> to vector<3x256xf32>
    %76 = vector.broadcast %74 : vector<1x256xf32> to vector<3x256xf32>
    %77 = arith.mulf %76, %75 : vector<3x256xf32>
    %78 = arith.addf %69, %77 : vector<3x256xf32>
    %cst_28 = arith.constant 1.000000e+00 : f32
    %79 = vector.broadcast %cst_28 : f32 to vector<1x256xf32>
    %80 = arith.subf %79, %73 : vector<1x256xf32>
    %81 = arith.mulf %72, %80 : vector<1x256xf32>
    %82 = vector.extract_strided_slice %52 {offsets = [0, 768], sizes = [1, 256], strides = [1, 1]} : vector<1x2048xf32> to vector<1x256xf32>
    %83 = arith.mulf %81, %82 : vector<1x256xf32>
    %84 = vector.extract_strided_slice %28 {offsets = [0, 768], sizes = [3, 256], strides = [1, 1]} : vector<3x2048xf32> to vector<3x256xf32>
    %85 = vector.broadcast %83 : vector<1x256xf32> to vector<3x256xf32>
    %86 = arith.mulf %85, %84 : vector<3x256xf32>
    %87 = arith.addf %78, %86 : vector<3x256xf32>
    %cst_29 = arith.constant 1.000000e+00 : f32
    %88 = vector.broadcast %cst_29 : f32 to vector<1x256xf32>
    %89 = arith.subf %88, %82 : vector<1x256xf32>
    %90 = arith.mulf %81, %89 : vector<1x256xf32>
    %91 = vector.extract_strided_slice %52 {offsets = [0, 1024], sizes = [1, 256], strides = [1, 1]} : vector<1x2048xf32> to vector<1x256xf32>
    %92 = arith.mulf %90, %91 : vector<1x256xf32>
    %93 = vector.extract_strided_slice %28 {offsets = [0, 1024], sizes = [3, 256], strides = [1, 1]} : vector<3x2048xf32> to vector<3x256xf32>
    %94 = vector.broadcast %92 : vector<1x256xf32> to vector<3x256xf32>
    %95 = arith.mulf %94, %93 : vector<3x256xf32>
    %96 = arith.addf %87, %95 : vector<3x256xf32>
    %cst_30 = arith.constant 1.000000e+00 : f32
    %97 = vector.broadcast %cst_30 : f32 to vector<1x256xf32>
    %98 = arith.subf %97, %91 : vector<1x256xf32>
    %99 = arith.mulf %90, %98 : vector<1x256xf32>
    %100 = vector.extract_strided_slice %52 {offsets = [0, 1280], sizes = [1, 256], strides = [1, 1]} : vector<1x2048xf32> to vector<1x256xf32>
    %101 = arith.mulf %99, %100 : vector<1x256xf32>
    %102 = vector.extract_strided_slice %28 {offsets = [0, 1280], sizes = [3, 256], strides = [1, 1]} : vector<3x2048xf32> to vector<3x256xf32>
    %103 = vector.broadcast %101 : vector<1x256xf32> to vector<3x256xf32>
    %104 = arith.mulf %103, %102 : vector<3x256xf32>
    %105 = arith.addf %96, %104 : vector<3x256xf32>
    %cst_31 = arith.constant 1.000000e+00 : f32
    %106 = vector.broadcast %cst_31 : f32 to vector<1x256xf32>
    %107 = arith.subf %106, %100 : vector<1x256xf32>
    %108 = arith.mulf %99, %107 : vector<1x256xf32>
    %109 = vector.extract_strided_slice %52 {offsets = [0, 1536], sizes = [1, 256], strides = [1, 1]} : vector<1x2048xf32> to vector<1x256xf32>
    %110 = arith.mulf %108, %109 : vector<1x256xf32>
    %111 = vector.extract_strided_slice %28 {offsets = [0, 1536], sizes = [3, 256], strides = [1, 1]} : vector<3x2048xf32> to vector<3x256xf32>
    %112 = vector.broadcast %110 : vector<1x256xf32> to vector<3x256xf32>
    %113 = arith.mulf %112, %111 : vector<3x256xf32>
    %114 = arith.addf %105, %113 : vector<3x256xf32>
    %cst_32 = arith.constant 1.000000e+00 : f32
    %115 = vector.broadcast %cst_32 : f32 to vector<1x256xf32>
    %116 = arith.subf %115, %109 : vector<1x256xf32>
    %117 = arith.mulf %108, %116 : vector<1x256xf32>
    %118 = vector.extract_strided_slice %52 {offsets = [0, 1792], sizes = [1, 256], strides = [1, 1]} : vector<1x2048xf32> to vector<1x256xf32>
    %119 = arith.mulf %117, %118 : vector<1x256xf32>
    %120 = vector.extract_strided_slice %28 {offsets = [0, 1792], sizes = [3, 256], strides = [1, 1]} : vector<3x2048xf32> to vector<3x256xf32>
    %121 = vector.broadcast %119 : vector<1x256xf32> to vector<3x256xf32>
    %122 = arith.mulf %121, %120 : vector<3x256xf32>
    %123 = arith.addf %114, %122 : vector<3x256xf32>
    %c0_33 = arith.constant 0 : index
    %c0_34 = arith.constant 0 : index
    %c0_35 = arith.constant 0 : index
    %124 = vector.load %arg8[%c0_33, %c0_34, %c0_35] : memref<1x3x256xf32, #tpu.memory_space<vmem>>, vector<1x3x256xf32>
    %125 = vector.shape_cast %124 : vector<1x3x256xf32> to vector<3x256xf32>
    %126 = vector.shape_cast %123 : vector<3x256xf32> to vector<1x3x256xf32>
    tpu.vector_store %arg8[%c0_33, %c0_34, %c0_35], %126 {strides = array<i32>} : memref<1x3x256xf32, #tpu.memory_space<vmem>>, vector<1x3x256xf32>,
    return
  }
  func.func @transform_0(%arg0: i32) -> (i32, i32) {
    %c0_i32 = arith.constant 0 : i32
    %c0_i32_0 = arith.constant 0 : i32
    %c0_i32_1 = arith.constant 0 : i32
    return %c0_i32, %c0_i32_0 : i32, i32
  }
  func.func @transform_1(%arg0: i32) -> (i32, i32, i32) {
    %c0_i32 = arith.constant 0 : i32
    %c0_i32_0 = arith.constant 0 : i32
    %c0_i32_1 = arith.constant 0 : i32
    return %arg0, %c0_i32, %c0_i32_0 : i32, i32, i32
  }
  func.func @transform_2(%arg0: i32) -> (i32, i32) {
    %c0_i32 = arith.constant 0 : i32
    %c0_i32_0 = arith.constant 0 : i32
    %c0_i32_1 = arith.constant 0 : i32
    return %c0_i32, %c0_i32_0 : i32, i32
  }
  func.func @transform_3(%arg0: i32) -> (i32, i32) {
    %c0_i32 = arith.constant 0 : i32
    %c0_i32_0 = arith.constant 0 : i32
    %c0_i32_1 = arith.constant 0 : i32
    return %c0_i32, %c0_i32_0 : i32, i32
  }
  func.func @transform_4(%arg0: i32) -> (i32, i32) {
    %c0_i32 = arith.constant 0 : i32
    %c0_i32_0 = arith.constant 0 : i32
    %c0_i32_1 = arith.constant 0 : i32
    return %c0_i32, %c0_i32_0 : i32, i32
  }
  func.func @transform_5(%arg0: i32) -> (i32, i32) {
    %c0_i32 = arith.constant 0 : i32
    %c0_i32_0 = arith.constant 0 : i32
    %c0_i32_1 = arith.constant 0 : i32
    return %c0_i32, %c0_i32_0 : i32, i32
  }
  func.func @transform_6(%arg0: i32) -> (i32, i32) {
    %c0_i32 = arith.constant 0 : i32
    %c0_i32_0 = arith.constant 0 : i32
    %c0_i32_1 = arith.constant 0 : i32
    return %c0_i32, %c0_i32_0 : i32, i32
  }
  func.func @transform_7(%arg0: i32) -> (i32, i32, i32) {
    %c0_i32 = arith.constant 0 : i32
    %c0_i32_0 = arith.constant 0 : i32
    %c0_i32_1 = arith.constant 0 : i32
    return %arg0, %c0_i32, %c0_i32_0 : i32, i32, i32
  }
}

</mosaic_0001>

<bundles_post_ra>
// kernel: _generate.1
= control target key start
LH: loop header
LB: loop body
LE: loop exit
PB: predicated region body
PF: predicated region fallthrough
CT: control target
= control target key end

     0   :  { %12 = vsyncpa [#allocation3], 0  ;;  %s3233_s24 = smov 0   ;;  %s4471_s0 = inlined_call_operand.hbm [shape: f32[64,2048], index: 0, kind: input, shape index: {}]   ;;  %s4472_s1 = inlined_call_operand.vmem [shape: f32[2,32,1], index: 1, kind: input, shape index: {}]   ;;  %s4473_s2 = inlined_call_operand.vmem [shape: f32[64,32], index: 2, kind: input, shape index: {}]   ;;  %s4474_s3 = inlined_call_operand.vmem [shape: bf16[64,64], index: 3, kind: input, shape index: {}]   ;;  %s4475_s4 = inlined_call_operand.vmem [shape: f32[64,1], index: 4, kind: input, shape index: {}]   ;;  %s4476_s5 = inlined_call_operand.vmem [shape: bf16[8,64], index: 5, kind: input, shape index: {}]   ;;  %s4477_s6 = inlined_call_operand.vmem [shape: f32[8,1], index: 6, kind: input, shape index: {}]   ;;  %s4478_s7 = inlined_call_operand.vmem [shape: f32[2,3,256], index: 7, kind: output, shape index: {}]  }
   0x1 LB: > { %s2816_s25 = sadd.s32 4294967295, %s3187_s24   ;;  %p2818_p0 = scmp.ge.s32.totalorder %s3187_s24, 1  ;;  %s3187_s24 = sphi %s3233_s24, %s18_s24  }
   0x2   : > { %p201_p1 = scmp.lt.s32.totalorder %s3187_s24, 3  ;;  %s3189_s26 = smov [#allocation2]  }
   0x3   : > { %s213_s27 = sshll.u32 %s3189_s26, 4  ;;  %p2939_p3 = scmp.eq.s32.totalorder %s2816_s25, 0  ;;  %s214_s27 = int_to_ptr.vmem [resolvable:$true] %s213_s27 }
   0x4   : > { %p3241_p2 = pnand %p2818_p0, %p201_p1  ;;  %s3162_s29 = scalar_lea.vmem %s214_s27, 16384 }
   0x5   : > { %p3163_p7 = scmp.ne.s32.totalorder %s214_s27, %s3162_s29  ;;  %p3170_p10 = scmp.lt.s32.totalorder %s214_s27, %s214_s27 }
   0x6   : > { %p2935_p4 = pneg %p3241_p2  ;;  %p3171_p11 = scmp.lt.s32.totalorder %s3162_s29, %s3162_s29 }
   0x8   : > { %p2936_p5 = pnand %p2939_p3, %p2935_p4  ;;  %p3172_p12 = por %p3171_p11, %p3170_p10 }
   0xa   : > { %p3153_p6 = pneg %p2936_p5 }
   0xc   : > { %p3165_p8 = pnand %p3163_p7, %p3153_p6 }
   0xe   : > { %p3166_p9 = pneg %p3165_p8 }
  0x10   : > { %p3173_p13 = pnand %p3172_p12, %p3166_p9 }
  0x12   : > { %3176 = shalt.err (!%p3173_p13)
}
  0x13   : > { %s3190_s30 = smov 2048   ;;  %s3191_s8 = smov 128  }
  0x14   : > { %2938 = dma.hbm_to_vmem [thread:$0]  (!%p2936_p5), %s4471_s0, 16384, %s214_s27, [#allocation3], %s3190_s30, %s3190_s30, %s3191_s8  }
  0x15   : > { %252 = sbr.rel (%p3241_p2) target bundleno = 1050 (0x41a), region = 48 }
  0x1a   : > { %3182 = dma.done.wait (%p2939_p3), [#allocation3], 16384  }
  0x1b   : > { %3184 = vsyncadd (%p2939_p3), [#allocation3], 4294950912  ;;  %p284_p0 = scmp.lt.s32.totalorder %s2816_s25, 1  ;;  %vm453_vm0 = vcmask 261120   ;;  %v441_v2 = vld [vmem:[%s4473_s2] sm:$0xff]  ;;  %v442_v5 = vld [vmem:[%s4473_s2 + $0x8] sm:$0xff] }
  0x1c   : > { %2919 = vmatprep.mubr.msk.f32.mxu0 %vm453_vm0, %v441_v2  ;;  %v443_v6 = vld [vmem:[%s4473_s2 + $0x10] sm:$0xff]  ;;  %v444_v7 = vld [vmem:[%s4473_s2 + $0x18] sm:$0xff]  ;;  %v445_v8 = vld [vmem:[%s4473_s2 + $0x20] sm:$0xff]  ;;  %v3192_v12 = vmov 0   ;;  %vm1003_vm1 = vcmask 523264  }
  0x1d   : > { %s4493_s25 = smov (!%p284_p0, %s2816_s25), 1  ;;  %v446_v9 = vld [vmem:[%s4473_s2 + $0x28] sm:$0xff]  ;;  %v447_v10 = vld [vmem:[%s4473_s2 + $0x30] sm:$0xff]  ;;  %v448_v11 = vld [vmem:[%s4473_s2 + $0x38] sm:$0xff]  ;;  %2954 = vset.pattern.permute.xlu1 %v3192_v12  ;;  %2953 = vset.pattern.permute.xlu0 %v3192_v12 }
  0x1e   : > { %s2897_s11 = sshll.u32 %s4493_s25, 5  ;;  %1048 = vmatprep.mubr.bf16.mxu1 %v3192_v12  ;;  %v439_v21 = vld [vmem:[%s4475_s4 + $0x38] sm:$0xff]  ;;  %v438_v22 = vld [vmem:[%s4475_s4 + $0x30] sm:$0xff]  ;;  %v437_v23 = vld [vmem:[%s4475_s4 + $0x28] sm:$0xff]  ;;  %s2898_s17 = sshll.u32 %s4493_s25, 3 }
  0x1f   : > { %s288_s14 = scalar_lea.vmem %s4472_s1, %s2897_s11  ;;  %v436_v24 = vld [vmem:[%s4475_s4 + $0x20] sm:$0xff]  ;;  %v435_v25 = vld [vmem:[%s4475_s4 + $0x18] sm:$0xff]  ;;  %v434_v26 = vld [vmem:[%s4475_s4 + $0x10] sm:$0xff]  ;;  %s293_s20 = scalar_lea.vmem %s4478_s7, %s2898_s17 }
  0x20   : > { %v452_v0 = vld [vmem:[%s288_s14 + $0x18] sm:$0xff]  ;;  %v451_v1 = vld [vmem:[%s288_s14 + $0x10] sm:$0xff]  ;;  %v450_v3 = vld [vmem:[%s288_s14 + $0x8] sm:$0xff] }
  0x21   : > { %2911 = vmatprep.subr.mxu0 %v452_v0  ;;  %v449_v4 = vld [vmem:[%s288_s14] sm:$0xff]  ;;  %v433_v27 = vld [vmem:[%s4475_s4 + $0x8] sm:$0xff]  ;;  %v362_v31 = vld [vmem:[#allocation2 + $0x218] sm:$0xff] }
  0x22   : > { %2912 = vmatpush3.msra.mxu0 %v452_v0  ;;  %v432_v28 = vld [vmem:[%s4475_s4] sm:$0xff]  ;;  %v360_v30 = vld [vmem:[#allocation2 + $0x208] sm:$0xff]  ;;  %v361_v33 = vld [vmem:[#allocation2 + $0x210] sm:$0xff] }
  0x23   : > { %2913 = vmatprep.subr.mxu0 %v451_v1  ;;  %v440_v29 = vld [vmem:[%s4477_s6] sm:$0xff]  ;;  %v364_v34 = vld [vmem:[#allocation2 + $0x228] sm:$0xff]  ;;  %v366_v35 = vld [vmem:[#allocation2 + $0x238] sm:$0xff] }
  0x24   : > { %2914 = vmatpush3.msra.mxu0 %v451_v1  ;;  %v359_v32 = vld [vmem:[#allocation2 + $0x200] sm:$0xff]  ;;  %v365_v38 = vld [vmem:[#allocation2 + $0x230] sm:$0xff]  ;;  %v392_v39 = vld [vmem:[#allocation2 + $0x308] sm:$0xff] }
  0x25   : > { %2915 = vmatprep.subr.mxu0 %v450_v3  ;;  %v363_v37 = vld [vmem:[#allocation2 + $0x220] sm:$0xff]  ;;  %v394_v40 = vld [vmem:[#allocation2 + $0x318] sm:$0xff]  ;;  %v393_v46 = vld [vmem:[#allocation2 + $0x310] sm:$0xff] }
  0x26   : > { %2916 = vmatpush3.msra.mxu0 %v450_v3  ;;  %v391_v45 = vld [vmem:[#allocation2 + $0x300] sm:$0xff]  ;;  %v376_v47 = vld [vmem:[#allocation2 + $0x288] sm:$0xff]  ;;  %v378_v51 = vld [vmem:[#allocation2 + $0x298] sm:$0xff] }
  0x27   : > { %2917 = vmatprep.subr.mxu0 %v449_v4  ;;  %v375_v53 = vld [vmem:[#allocation2 + $0x280] sm:$0xff]  ;;  %v377_v54 = vld [vmem:[#allocation2 + $0x290] sm:$0xff]  ;;  %v408_v63 = vld [vmem:[#allocation2 + $0x388] sm:$0xff] }
  0x28   : > { %2918 = vmatpush3.msra.mxu0 %v449_v4  ;;  %v410_v4 = vld [vmem:[#allocation2 + $0x398] sm:$0xff] }
  0x29   : > { %2920 = vmatmul.mubr.msk.f32.vlgmr.msra.gmra.mxu0 %vm453_vm0, %v442_v5  ;;  %v407_v5 = vld [vmem:[#allocation2 + $0x380] sm:$0xff] }
  0x2a   : > { %2922 = vmatprep.mubr.msk.f32.mxu0 %vm453_vm0, %v443_v6  ;;  %v409_v6 = vld [vmem:[#allocation2 + $0x390] sm:$0xff] }
  0x2d   : > { %2923 = vmatmul.mubr.msk.f32.gmra.mxu0 %vm453_vm0, %v444_v7 }
  0x2e   : > { %2925 = vmatprep.mubr.msk.f32.mxu0 %vm453_vm0, %v445_v8 }
  0x31   : > { %2926 = vmatmul.mubr.msk.f32.gmra.mxu0 %vm453_vm0, %v446_v9 }
  0x32   : > { %2928 = vmatprep.mubr.msk.f32.mxu0 %vm453_vm0, %v447_v10 }
  0x35   : > { %2929 = vmatmul.mubr.msk.f32.gmra.mxu0 %vm453_vm0, %v448_v11 }
  0x36   : > { %1121 = vmatprep.mubr.bf16.mxu0 %v3192_v12 }
  0xe9   : > { %v2921_v13 = vpop.f32.mrf.mxu0 }
  0xeb   : > { %v544_v14 = vpop.f32.mrf.mxu0 }
  0xed   : > { %v2924_v15 = vpop.f32.mrf.mxu0 }
  0xef   : > { %v554_v16 = vpop.f32.mrf.mxu0 }
  0xf1   : > { %v2927_v17 = vpop.f32.mrf.mxu0 }
  0xf3   : > { %v564_v18 = vpop.f32.mrf.mxu0 }
  0xf4   : > { %605 = vperm.xlu1 %2954, %v564_v18  }
  0xf5   : > { %v2930_v19 = vpop.f32.mrf.mxu0 }
  0xf7   : > { %v574_v20 = vpop.f32.mrf.mxu0 }
  0xf8   : > { %610 = vperm.xlu1 %2954, %v2927_v17   ;;  %615 = vperm.xlu0 %2953, %v574_v20  }
  0xfc   : > { %600 = vperm.xlu1 %2954, %v2924_v15   ;;  %620 = vperm.xlu0 %2953, %v2930_v19  }
 0x100   : > { %590 = vperm.xlu1 %2954, %v2921_v13   ;;  %595 = vperm.xlu0 %2953, %v554_v16  }
 0x104   : > { %585 = vperm.xlu0 %2953, %v544_v14   ;;  %980 = vperm.xlu1 %2954, %v439_v21  }
 0x108   : > { %975 = vperm.xlu0 %2953, %v438_v22   ;;  %970 = vperm.xlu1 %2954, %v437_v23   ;;  %v344_v22 = vld [vmem:[#allocation2 + $0x188] sm:$0xff] }
 0x10c   : > { %965 = vperm.xlu0 %2953, %v436_v24   ;;  %960 = vperm.xlu1 %2954, %v435_v25  }
 0x110   : > { %955 = vperm.xlu0 %2953, %v434_v26   ;;  %950 = vperm.xlu1 %2954, %v433_v27   ;;  %v346_v27 = vld [vmem:[#allocation2 + $0x198] sm:$0xff] }
 0x114   : > { %945 = vperm.xlu0 %2953, %v432_v28   ;;  %v343_v28 = vld [vmem:[#allocation2 + $0x180] sm:$0xff] }
 0x118   : > { %1794 = vperm.xlu0 %2953, %v440_v29   ;;  %v345_v29 = vld [vmem:[#allocation2 + $0x190] sm:$0xff] }
 0x16f   : > { %v3324_v36 = vpop.permute.xlu1 %605 }
 0x170   : > { %v688_v41 = vadd.f32 %v3324_v36, %v360_v30  ;;  %v690_v42 = vadd.f32 %v3324_v36, %v362_v31  ;;  %v687_v43 = vadd.f32 %v3324_v36, %v359_v32  ;;  %v689_v44 = vadd.f32 %v3324_v36, %v361_v33 }
 0x171   : > { %v3331_v48 = vadd.f32 %v3324_v36, %v364_v34  ;;  %v3334_v49 = vadd.f32 %v3324_v36, %v366_v35  ;;  %v3337_v55 = vadd.f32 %v3324_v36, %v363_v37  ;;  %v3340_v56 = vadd.f32 %v3324_v36, %v365_v38 }
 0x172   : > { %v816_v50 = vmax.f32 %v688_v41, 0.0  ;;  %v818_v52 = vmax.f32 %v690_v42, 0.0  ;;  %v815_v59 = vmax.f32 %v687_v43, 0.0  ;;  %v817_v60 = vmax.f32 %v689_v44, 0.0  ;;  %v327_v44 = vld [vmem:[#allocation2 + $0x100] sm:$0xff] }
 0x173   : > { %v3342_v57 = vpop.permute.xlu1 %610  ;;  %v3344_v58 = vpop.permute.xlu0 %615  ;;  %v820_v61 = vmax.f32 %v3331_v48, 0.0  ;;  %v822_v62 = vmax.f32 %v3334_v49, 0.0 }
 0x174   : > { %v720_v0 = vadd.f32 %v3344_v58, %v392_v39  ;;  %v722_v1 = vadd.f32 %v3344_v58, %v394_v40  ;;  %v719_v2 = vadd.f32 %v3344_v58, %v391_v45  ;;  %v721_v3 = vadd.f32 %v3344_v58, %v393_v46  ;;  %v328_v39 = vld [vmem:[#allocation2 + $0x108] sm:$0xff]  ;;  %v330_v40 = vld [vmem:[#allocation2 + $0x118] sm:$0xff]  ;;  %v329_v46 = vld [vmem:[#allocation2 + $0x110] sm:$0xff] }
 0x175   : > { %v704_v7 = vadd.f32 %v3342_v57, %v376_v47  ;;  %v706_v8 = vadd.f32 %v3342_v57, %v378_v51  ;;  %v703_v9 = vadd.f32 %v3342_v57, %v375_v53  ;;  %v705_v10 = vadd.f32 %v3342_v57, %v377_v54 }
 0x176   : > { %v848_v11 = vmax.f32 %v720_v0, 0.0  ;;  %v850_v13 = vmax.f32 %v722_v1, 0.0  ;;  %v847_v14 = vmax.f32 %v719_v2, 0.0  ;;  %v849_v15 = vmax.f32 %v721_v3, 0.0  ;;  %v296_v3 = vld [vmem:[#allocation2 + $0x8] sm:$0xff] }
 0x177   : > { %v3356_v16 = vpop.permute.xlu1 %600  ;;  %v3358_v17 = vpop.permute.xlu0 %620  ;;  %v832_v18 = vmax.f32 %v704_v7, 0.0  ;;  %v834_v19 = vmax.f32 %v706_v8, 0.0  ;;  %v831_v20 = vmax.f32 %v703_v9, 0.0  ;;  %v833_v21 = vmax.f32 %v705_v10, 0.0 }
 0x178   : > { %v736_v23 = vadd.f32 %v3358_v17, %v408_v63  ;;  %v738_v24 = vadd.f32 %v3358_v17, %v410_v4  ;;  %v735_v25 = vadd.f32 %v3358_v17, %v407_v5  ;;  %v737_v26 = vadd.f32 %v3358_v17, %v409_v6  ;;  %v298_v4 = vld [vmem:[#allocation2 + $0x18] sm:$0xff] }
 0x179   : > { %v912_v30 = vpack.c.bf16 %v832_v18, %v816_v50  ;;  %v914_v31 = vpack.c.bf16 %v834_v19, %v818_v52  ;;  %v911_v32 = vpack.c.bf16 %v831_v20, %v815_v59  ;;  %v913_v33 = vpack.c.bf16 %v833_v21, %v817_v60  ;;  %v312_v59 = vld [vmem:[#allocation2 + $0x88] sm:$0xff]  ;;  %v314_v60 = vld [vmem:[#allocation2 + $0x98] sm:$0xff]  ;;  %v295_v21 = vld [vmem:[#allocation2] sm:$0xff] }
 0x17a   : > { %v864_v34 = vmax.f32 %v736_v23, 0.0  ;;  %v866_v35 = vmax.f32 %v738_v24, 0.0  ;;  %v863_v37 = vmax.f32 %v735_v25, 0.0  ;;  %v865_v38 = vmax.f32 %v737_v26, 0.0  ;;  %v297_v23 = vld [vmem:[#allocation2 + $0x10] sm:$0xff] }
 0x17b   : > { %v3364_v41 = vpop.permute.xlu0 %595  ;;  %v672_v42 = vadd.f32 %v3356_v16, %v344_v22  ;;  %v674_v43 = vadd.f32 %v3356_v16, %v346_v27  ;;  %v671_v45 = vadd.f32 %v3356_v16, %v343_v28  ;;  %v673_v47 = vadd.f32 %v3356_v16, %v345_v29  ;;  %v3370_v50 = vpop.permute.xlu1 %590  ;;  %v311_v22 = vld [vmem:[#allocation2 + $0x80] sm:$0xff]  ;;  %v313_v28 = vld [vmem:[#allocation2 + $0x90] sm:$0xff] }
 0x17c   : > { %v928_v51 = vpack.c.bf16 %v864_v34, %v848_v11  ;;  %v930_v52 = vpack.c.bf16 %v866_v35, %v850_v13  ;;  %v927_v53 = vpack.c.bf16 %v863_v37, %v847_v14  ;;  %v929_v54 = vpack.c.bf16 %v865_v38, %v849_v15 }
 0x17d   : > { %v656_v63 = vadd.f32 %v3364_v41, %v328_v39  ;;  %v800_v0 = vmax.f32 %v672_v42, 0.0  ;;  %v658_v1 = vadd.f32 %v3364_v41, %v330_v40  ;;  %v802_v2 = vmax.f32 %v674_v43, 0.0  ;;  %v412_v40 = vld [vmem:[#allocation2 + $0x3a8] sm:$0xff]  ;;  %v398_v42 = vld [vmem:[#allocation2 + $0x338] sm:$0xff] }
 0x17e   : > { %1024 = vmatprep.subr.bf16.mxu1 %v928_v51  ;;  %1097 = vmatprep.subr.bf16.mxu0 %v930_v52  ;;  %v655_v5 = vadd.f32 %v3364_v41, %v327_v44  ;;  %v799_v6 = vmax.f32 %v671_v45, 0.0  ;;  %v657_v7 = vadd.f32 %v3364_v41, %v329_v46  ;;  %v801_v8 = vmax.f32 %v673_v47, 0.0  ;;  %v414_v43 = vld [vmem:[#allocation2 + $0x3b8] sm:$0xff] }
 0x17f   : > { %v3376_v9 = vpop.permute.xlu0 %585  ;;  %1025 = vmatpush1.bf16.msra.mxu1 %v927_v53  ;;  %1098 = vmatpush1.bf16.msra.mxu0 %v929_v54  ;;  %v784_v10 = vmax.f32 %v656_v63, 0.0  ;;  %v786_v11 = vmax.f32 %v658_v1, 0.0  ;;  %v640_v13 = vadd.f32 %v3370_v50, %v312_v59  ;;  %v642_v14 = vadd.f32 %v3370_v50, %v314_v60 }
 0x180   : > { %1026 = vmatprep.subr.bf16.mxu1 %v912_v30  ;;  %1099 = vmatprep.subr.bf16.mxu0 %v914_v31  ;;  %v783_v15 = vmax.f32 %v655_v5, 0.0  ;;  %v785_v18 = vmax.f32 %v657_v7, 0.0  ;;  %v624_v19 = vadd.f32 %v3376_v9, %v296_v3  ;;  %v626_v20 = vadd.f32 %v3376_v9, %v298_v4  ;;  %v396_v30 = vld [vmem:[#allocation2 + $0x328] sm:$0xff]  ;;  %v413_v3 = vld [vmem:[#allocation2 + $0x3b0] sm:$0xff] }
 0x181   : > { %v896_v24 = vpack.c.bf16 %v800_v0, %v784_v10  ;;  %v898_v25 = vpack.c.bf16 %v802_v2, %v786_v11  ;;  %v768_v26 = vmax.f32 %v640_v13, 0.0  ;;  %v770_v27 = vmax.f32 %v642_v14, 0.0  ;;  %v397_v2 = vld [vmem:[#allocation2 + $0x330] sm:$0xff]  ;;  %v382_v10 = vld [vmem:[#allocation2 + $0x2b8] sm:$0xff] }
 0x182   : > { %v895_v29 = vpack.c.bf16 %v799_v6, %v783_v15  ;;  %v897_v34 = vpack.c.bf16 %v801_v8, %v785_v18  ;;  %v752_v35 = vmax.f32 %v624_v19, 0.0  ;;  %v754_v37 = vmax.f32 %v626_v20, 0.0  ;;  %v380_v8 = vld [vmem:[#allocation2 + $0x2a8] sm:$0xff]  ;;  %v379_v18 = vld [vmem:[#allocation2 + $0x2a0] sm:$0xff] }
 0x183   : > { %1027 = vmatpush1.bf16.msra.mxu1 %v911_v32  ;;  %1100 = vmatpush1.bf16.msra.mxu0 %v913_v33  ;;  %v623_v31 = vadd.f32 %v3376_v9, %v295_v21  ;;  %v639_v38 = vadd.f32 %v3370_v50, %v311_v22  ;;  %v625_v39 = vadd.f32 %v3376_v9, %v297_v23  ;;  %v819_v44 = vmax.f32 %v3337_v55, 0.0  ;;  %v395_v32 = vld [vmem:[#allocation2 + $0x320] sm:$0xff]  ;;  %v381_v23 = vld [vmem:[#allocation2 + $0x2b0] sm:$0xff] }
 0x184   : > { %1028 = vmatprep.subr.bf16.mxu1 %v896_v24  ;;  %1101 = vmatprep.subr.bf16.mxu0 %v898_v25  ;;  %v880_v45 = vpack.c.bf16 %v768_v26, %v752_v35  ;;  %v882_v46 = vpack.c.bf16 %v770_v27, %v754_v37  ;;  %v641_v47 = vadd.f32 %v3370_v50, %v313_v28  ;;  %v411_v33 = vld [vmem:[#allocation2 + $0x3a0] sm:$0xff]  ;;  %v821_v51 = vmax.f32 %v3340_v56, 0.0  ;;  %v332_v24 = vld [vmem:[#allocation2 + $0x128] sm:$0xff]  ;;  %v334_v35 = vld [vmem:[#allocation2 + $0x138] sm:$0xff] }
 0x185   : > { %v751_v52 = vmax.f32 %v623_v31, 0.0  ;;  %v767_v53 = vmax.f32 %v639_v38, 0.0  ;;  %v753_v54 = vmax.f32 %v625_v39, 0.0  ;;  %v724_v59 = vadd.f32 %v3344_v58, %v396_v30  ;;  %v3399_v27 = vld [vmem:[%s4474_s3] sm:$0xff]   ;;  %v3430_v56 = vld [vmem:[%s4474_s3 + $0x8] sm:$0xff]  }
 0x186   : > { %v769_v60 = vmax.f32 %v641_v47, 0.0  ;;  %v740_v63 = vadd.f32 %v3358_v17, %v412_v40  ;;  %v726_v0 = vadd.f32 %v3344_v58, %v398_v42  ;;  %v742_v1 = vadd.f32 %v3358_v17, %v414_v43 }
 0x187   : > { %1029 = vmatpush1.bf16.msra.mxu1 %v895_v29  ;;  %1102 = vmatpush1.bf16.msra.mxu0 %v897_v34  ;;  %v879_v4 = vpack.c.bf16 %v767_v53, %v751_v52  ;;  %v852_v5 = vmax.f32 %v724_v59, 0.0  ;;  %v723_v6 = vadd.f32 %v3344_v58, %v395_v32  ;;  %v739_v7 = vadd.f32 %v3358_v17, %v411_v33  ;;  %v348_v34 = vld [vmem:[#allocation2 + $0x1a8] sm:$0xff]  ;;  %v331_v52 = vld [vmem:[#allocation2 + $0x120] sm:$0xff] }
 0x188   : > { %1030 = vmatprep.subr.bf16.mxu1 %v880_v45  ;;  %1103 = vmatprep.subr.bf16.mxu0 %v882_v46  ;;  %v881_v11 = vpack.c.bf16 %v769_v60, %v753_v54  ;;  %v868_v13 = vmax.f32 %v740_v63, 0.0  ;;  %v854_v14 = vmax.f32 %v726_v0, 0.0  ;;  %v870_v15 = vmax.f32 %v742_v1, 0.0  ;;  %v350_v45 = vld [vmem:[#allocation2 + $0x1b8] sm:$0xff]  ;;  %v347_v53 = vld [vmem:[#allocation2 + $0x1a0] sm:$0xff]  ;;  %v333_v0 = vld [vmem:[#allocation2 + $0x130] sm:$0xff] }
 0x189   : > { %v851_v19 = vmax.f32 %v723_v6, 0.0  ;;  %v867_v20 = vmax.f32 %v739_v7, 0.0  ;;  %v725_v21 = vadd.f32 %v3344_v58, %v397_v2  ;;  %v741_v22 = vadd.f32 %v3358_v17, %v413_v3  ;;  %v349_v1 = vld [vmem:[#allocation2 + $0x1b0] sm:$0xff]  ;;  %v300_v6 = vld [vmem:[#allocation2 + $0x28] sm:$0xff] }
 0x18a   : > { %v932_v25 = vpack.c.bf16 %v868_v13, %v852_v5  ;;  %v934_v26 = vpack.c.bf16 %v870_v15, %v854_v14  ;;  %v708_v28 = vadd.f32 %v3342_v57, %v380_v8  ;;  %v710_v29 = vadd.f32 %v3342_v57, %v382_v10  ;;  %v316_v7 = vld [vmem:[#allocation2 + $0xa8] sm:$0xff] }
 0x18b   : > { %1031 = vmatpush1.bf16.msra.mxu1 %v879_v4  ;;  %1104 = vmatpush1.bf16.msra.mxu0 %v881_v11  ;;  %v931_v37 = vpack.c.bf16 %v867_v20, %v851_v19  ;;  %v853_v30 = vmax.f32 %v725_v21, 0.0  ;;  %v869_v31 = vmax.f32 %v741_v22, 0.0  ;;  %v707_v38 = vadd.f32 %v3342_v57, %v379_v18  ;;  %v318_v11 = vld [vmem:[#allocation2 + $0xb8] sm:$0xff]  ;;  %v299_v18 = vld [vmem:[#allocation2 + $0x20] sm:$0xff] }
 0x18c   : > { %1170 = vmatprep.subr.bf16.mxu1 %v932_v25  ;;  %1243 = vmatprep.subr.bf16.mxu0 %v934_v26  ;;  %v836_v39 = vmax.f32 %v708_v28, 0.0  ;;  %v838_v40 = vmax.f32 %v710_v29, 0.0  ;;  %v709_v42 = vadd.f32 %v3342_v57, %v381_v23  ;;  %v660_v43 = vadd.f32 %v3364_v41, %v332_v24  ;;  %v315_v19 = vld [vmem:[#allocation2 + $0xa0] sm:$0xff]  ;;  %v301_v24 = vld [vmem:[#allocation2 + $0x30] sm:$0xff] }
 0x18d   : > { %v933_v46 = vpack.c.bf16 %v869_v31, %v853_v30  ;;  %v835_v47 = vmax.f32 %v707_v38, 0.0  ;;  %v676_v32 = vadd.f32 %v3356_v16, %v348_v34  ;;  %v662_v33 = vadd.f32 %v3364_v41, %v334_v35  ;;  %v317_v25 = vld [vmem:[#allocation2 + $0xb0] sm:$0xff]  ;;  %v400_v35 = vld [vmem:[#allocation2 + $0x348] sm:$0xff] }
 0x18e   : > { %2839 = vmatmul.mubr.msk.bf16.vlgmr.msra.gmra.mxu1 %vm1003_vm1, %v3399_v27  ;;  %2843 = vmatmul.mubr.msk.bf16.vlgmr.msra.gmra.mxu0 %vm1003_vm1, %v3399_v27  ;;  %v916_v54 = vpack.c.bf16 %v836_v39, %v820_v61  ;;  %v918_v59 = vpack.c.bf16 %v838_v40, %v822_v62  ;;  %v837_v60 = vmax.f32 %v709_v42, 0.0  ;;  %v788_v63 = vmax.f32 %v660_v43, 0.0  ;;  %v302_v62 = vld [vmem:[#allocation2 + $0x38] sm:$0xff] }
 0x18f   : > { %1171 = vmatpush1.bf16.msra.mxu1 %v931_v37  ;;  %1244 = vmatpush1.bf16.msra.mxu0 %v933_v46  ;;  %v915_v2 = vpack.c.bf16 %v835_v47, %v819_v44  ;;  %v804_v3 = vmax.f32 %v676_v32, 0.0  ;;  %v678_v4 = vadd.f32 %v3356_v16, %v350_v45  ;;  %v790_v5 = vmax.f32 %v662_v33, 0.0  ;;  %v416_v37 = vld [vmem:[#allocation2 + $0x3c8] sm:$0xff]  ;;  %v402_v40 = vld [vmem:[#allocation2 + $0x358] sm:$0xff] }
 0x190   : > { %1172 = vmatprep.subr.bf16.mxu1 %v916_v54  ;;  %1245 = vmatprep.subr.bf16.mxu0 %v918_v59  ;;  %v917_v48 = vpack.c.bf16 %v837_v60, %v821_v51  ;;  %v659_v49 = vadd.f32 %v3364_v41, %v331_v52  ;;  %v675_v61 = vadd.f32 %v3356_v16, %v347_v53  ;;  %v418_v47 = vld [vmem:[#allocation2 + $0x3d8] sm:$0xff] }
 0x191   : > { %v900_v8 = vpack.c.bf16 %v804_v3, %v788_v63  ;;  %v806_v10 = vmax.f32 %v678_v4, 0.0  ;;  %1058 = vmatprep.mubr.bf16.mxu1 %v3192_v12  ;;  %1131 = vmatprep.mubr.bf16.mxu0 %v3192_v12  ;;  %v661_v55 = vadd.f32 %v3364_v41, %v333_v0  ;;  %v677_v44 = vadd.f32 %v3356_v16, %v349_v1  ;;  %v415_v4 = vld [vmem:[#allocation2 + $0x3c0] sm:$0xff] }
 0x192   : > { %v787_v51 = vmax.f32 %v659_v49, 0.0  ;;  %v803_v13 = vmax.f32 %v675_v61, 0.0  ;;  %v628_v14 = vadd.f32 %v3376_v9, %v300_v6  ;;  %v644_v15 = vadd.f32 %v3370_v50, %v316_v7  ;;  %v3453_v6 = vld [vmem:[%s4474_s3 + $0x10] sm:$0xff]   ;;  %v399_v61 = vld [vmem:[#allocation2 + $0x340] sm:$0xff] }
 0x193   : > { %1173 = vmatpush1.bf16.msra.mxu1 %v915_v2  ;;  %1246 = vmatpush1.bf16.msra.mxu0 %v917_v48  ;;  %v902_v20 = vpack.c.bf16 %v806_v10, %v790_v5  ;;  %v789_v21 = vmax.f32 %v661_v55, 0.0  ;;  %v805_v22 = vmax.f32 %v677_v44, 0.0  ;;  %v630_v23 = vadd.f32 %v3376_v9, %v302_v62  ;;  %v417_v62 = vld [vmem:[#allocation2 + $0x3d0] sm:$0xff]  ;;  %v368_v44 = vld [vmem:[#allocation2 + $0x248] sm:$0xff] }
 0x194   : > { %1174 = vmatprep.subr.bf16.mxu1 %v900_v8  ;;  %v899_v26 = vpack.c.bf16 %v803_v13, %v787_v51  ;;  %v756_v28 = vmax.f32 %v628_v14, 0.0  ;;  %v772_v29 = vmax.f32 %v644_v15, 0.0  ;;  %v646_v34 = vadd.f32 %v3370_v50, %v318_v11  ;;  %v401_v10 = vld [vmem:[#allocation2 + $0x350] sm:$0xff]  ;;  %v384_v13 = vld [vmem:[#allocation2 + $0x2c8] sm:$0xff]  ;;  %v386_v15 = vld [vmem:[#allocation2 + $0x2d8] sm:$0xff] }
 0x195   : > { %1247 = vmatprep.subr.bf16.mxu0 %v902_v20  ;;  %v901_v30 = vpack.c.bf16 %v805_v22, %v789_v21  ;;  %v758_v31 = vmax.f32 %v630_v23, 0.0  ;;  %v627_v38 = vadd.f32 %v3376_v9, %v299_v18  ;;  %v643_v39 = vadd.f32 %v3370_v50, %v315_v19  ;;  %v383_v18 = vld [vmem:[#allocation2 + $0x2c0] sm:$0xff]  ;;  %v370_v21 = vld [vmem:[#allocation2 + $0x258] sm:$0xff]  ;;  %v385_v22 = vld [vmem:[#allocation2 + $0x2d0] sm:$0xff] }
 0x196   : > { %2840 = vmatmul.mubr.msk.bf16.gmra.mxu1 %vm1003_vm1, %v3430_v56  ;;  %2844 = vmatmul.mubr.msk.bf16.gmra.mxu0 %vm1003_vm1, %v3430_v56  ;;  %v884_v42 = vpack.c.bf16 %v772_v29, %v756_v28  ;;  %v774_v43 = vmax.f32 %v646_v34, 0.0  ;;  %v629_v45 = vadd.f32 %v3376_v9, %v301_v24  ;;  %v645_v46 = vadd.f32 %v3370_v50, %v317_v25  ;;  %v336_v23 = vld [vmem:[#allocation2 + $0x148] sm:$0xff]  ;;  %v367_v25 = vld [vmem:[#allocation2 + $0x240] sm:$0xff]  ;;  %v338_v28 = vld [vmem:[#allocation2 + $0x158] sm:$0xff] }
 0x197   : > { %1175 = vmatpush1.bf16.msra.mxu1 %v899_v26  ;;  %1248 = vmatpush1.bf16.msra.mxu0 %v901_v30  ;;  %v755_v32 = vmax.f32 %v627_v38, 0.0  ;;  %v771_v33 = vmax.f32 %v643_v39, 0.0  ;;  %v728_v52 = vadd.f32 %v3344_v58, %v400_v35  ;;  %v744_v53 = vadd.f32 %v3358_v17, %v416_v37  ;;  %v369_v26 = vld [vmem:[#allocation2 + $0x250] sm:$0xff]  ;;  %v3470_v29 = vld [vmem:[%s4474_s3 + $0x18] sm:$0xff]   ;;  %v335_v38 = vld [vmem:[#allocation2 + $0x140] sm:$0xff] }
 0x198   : > { %1176 = vmatprep.subr.bf16.mxu1 %v884_v42  ;;  %v886_v54 = vpack.c.bf16 %v774_v43, %v758_v31  ;;  %v757_v59 = vmax.f32 %v629_v45, 0.0  ;;  %v773_v60 = vmax.f32 %v645_v46, 0.0  ;;  %v730_v63 = vadd.f32 %v3344_v58, %v402_v40  ;;  %1068 = vmatprep.mubr.bf16.mxu1 %v3192_v12  ;;  %v352_v31 = vld [vmem:[#allocation2 + $0x1c8] sm:$0xff]  ;;  %v354_v45 = vld [vmem:[#allocation2 + $0x1d8] sm:$0xff] }
 0x199   : > { %v883_v0 = vpack.c.bf16 %v771_v33, %v755_v32  ;;  %v856_v1 = vmax.f32 %v728_v52, 0.0  ;;  %v872_v2 = vmax.f32 %v744_v53, 0.0  ;;  %v746_v3 = vadd.f32 %v3358_v17, %v418_v47  ;;  %1141 = vmatprep.mubr.bf16.mxu0 %v3192_v12  ;;  %v351_v52 = vld [vmem:[#allocation2 + $0x1c0] sm:$0xff] }
 0x19a   : > { %1249 = vmatprep.subr.bf16.mxu0 %v886_v54  ;;  %v885_v5 = vpack.c.bf16 %v773_v60, %v757_v59  ;;  %v858_v48 = vmax.f32 %v730_v63, 0.0  ;;  %v743_v8 = vadd.f32 %v3358_v17, %v415_v4  ;;  %v727_v11 = vadd.f32 %v3344_v58, %v399_v61  ;;  %v337_v63 = vld [vmem:[#allocation2 + $0x150] sm:$0xff]  ;;  %v304_v61 = vld [vmem:[#allocation2 + $0x48] sm:$0xff] }
 0x19b   : > { %1177 = vmatpush1.bf16.msra.mxu1 %v883_v0  ;;  %v936_v7 = vpack.c.bf16 %v872_v2, %v856_v1  ;;  %v874_v49 = vmax.f32 %v746_v3, 0.0  ;;  %v745_v51 = vadd.f32 %v3358_v17, %v417_v62  ;;  %v729_v14 = vadd.f32 %v3344_v58, %v401_v10  ;;  %v353_v0 = vld [vmem:[#allocation2 + $0x1d0] sm:$0xff] }
 0x19c   : > { %1250 = vmatpush1.bf16.msra.mxu0 %v885_v5  ;;  %v871_v19 = vmax.f32 %v743_v8, 0.0  ;;  %v696_v20 = vadd.f32 %v3324_v36, %v368_v44  ;;  %v712_v24 = vadd.f32 %v3342_v57, %v384_v13  ;;  %v855_v34 = vmax.f32 %v727_v11, 0.0  ;;  %v320_v44 = vld [vmem:[#allocation2 + $0xc8] sm:$0xff] }
 0x19d   : > { %1316 = vmatprep.subr.bf16.mxu1 %v936_v7  ;;  %v938_v55 = vpack.c.bf16 %v874_v49, %v858_v48  ;;  %v873_v35 = vmax.f32 %v745_v51, 0.0  ;;  %v714_v37 = vadd.f32 %v3342_v57, %v386_v15  ;;  %v711_v30 = vadd.f32 %v3342_v57, %v383_v18  ;;  %v306_v15 = vld [vmem:[#allocation2 + $0x58] sm:$0xff] }
 0x19e   : > { %2841 = vmatmul.mubr.msk.bf16.gmra.mxu1 %vm1003_vm1, %v3453_v6  ;;  %2845 = vmatmul.mubr.msk.bf16.gmra.mxu0 %vm1003_vm1, %v3453_v6  ;;  %v857_v39 = vmax.f32 %v729_v14, 0.0  ;;  %v698_v40 = vadd.f32 %v3324_v36, %v370_v21  ;;  %v713_v42 = vadd.f32 %v3342_v57, %v385_v22  ;;  %v664_v43 = vadd.f32 %v3364_v41, %v336_v23  ;;  %v322_v22 = vld [vmem:[#allocation2 + $0xd8] sm:$0xff]  ;;  %v303_v23 = vld [vmem:[#allocation2 + $0x40] sm:$0xff] }
 0x19f   : > { %1389 = vmatprep.subr.bf16.mxu0 %v938_v55  ;;  %1078 = vmatprep.mubr.bf16.mxu1 %v3192_v12  ;;  %v3477_v46 = vpack.c.bf16 %v871_v19, %v855_v34  ;;  %v824_v47 = vmax.f32 %v696_v20, 0.0  ;;  %v695_v32 = vadd.f32 %v3324_v36, %v367_v25  ;;  %v666_v33 = vadd.f32 %v3364_v41, %v338_v28 }
 0x1a0   : > { %1151 = vmatprep.mubr.bf16.mxu0 %v3192_v12  ;;  %v840_v53 = vmax.f32 %v712_v24, 0.0  ;;  %v697_v54 = vadd.f32 %v3324_v36, %v369_v26  ;;  %v680_v59 = vadd.f32 %v3356_v16, %v352_v31  ;;  %v663_v60 = vadd.f32 %v3364_v41, %v335_v38  ;;  %v319_v24 = vld [vmem:[#allocation2 + $0xc0] sm:$0xff] }
 0x1a1   : > { %v937_v1 = vpack.c.bf16 %v873_v35, %v857_v39  ;;  %v842_v2 = vmax.f32 %v714_v37, 0.0  ;;  %v839_v3 = vmax.f32 %v711_v30, 0.0  ;;  %v682_v4 = vadd.f32 %v3356_v16, %v354_v45  ;;  %v305_v35 = vld [vmem:[#allocation2 + $0x50] sm:$0xff]  ;;  %v403_v37 = vld [vmem:[#allocation2 + $0x360] sm:$0xff] }
 0x1a2   : > { %v826_v5 = vmax.f32 %v698_v40, 0.0  ;;  %v841_v7 = vmax.f32 %v713_v42, 0.0  ;;  %v792_v48 = vmax.f32 %v664_v43, 0.0  ;;  %v679_v49 = vadd.f32 %v3356_v16, %v351_v52  ;;  %v419_v30 = vld [vmem:[#allocation2 + $0x3e0] sm:$0xff]  ;;  %v420_v42 = vld [vmem:[#allocation2 + $0x3e8] sm:$0xff]  ;;  %v405_v43 = vld [vmem:[#allocation2 + $0x370] sm:$0xff] }
 0x1a3   : > { %v823_v62 = vmax.f32 %v695_v32, 0.0  ;;  %v794_v8 = vmax.f32 %v666_v33, 0.0  ;;  %v3493_v10 = vadd.f32 %v3364_v41, %v337_v63  ;;  %v3496_v55 = vadd.f32 %v3356_v16, %v353_v0  ;;  %v421_v45 = vld [vmem:[#allocation2 + $0x3f0] sm:$0xff]  ;;  %v404_v63 = vld [vmem:[#allocation2 + $0x368] sm:$0xff] }
 0x1a4   : > { %v920_v11 = vpack.c.bf16 %v840_v53, %v824_v47  ;;  %v825_v51 = vmax.f32 %v697_v54, 0.0  ;;  %v808_v13 = vmax.f32 %v680_v59, 0.0  ;;  %v791_v14 = vmax.f32 %v663_v60, 0.0  ;;  %v321_v53 = vld [vmem:[#allocation2 + $0xd0] sm:$0xff]  ;;  %v422_v54 = vld [vmem:[#allocation2 + $0x3f8] sm:$0xff] }
 0x1a5   : > { %v922_v18 = vpack.c.bf16 %v842_v2, %v826_v5  ;;  %v919_v19 = vpack.c.bf16 %v839_v3, %v823_v62  ;;  %v810_v20 = vmax.f32 %v682_v4, 0.0  ;;  %v3499_v21 = vadd.f32 %v3376_v9, %v304_v61  ;;  %v406_v5 = vld [vmem:[#allocation2 + $0x378] sm:$0xff] }
 0x1a6   : > { %2842 = vmatmul.mubr.msk.bf16.gmra.mxu1 %vm1003_vm1, %v3470_v29  ;;  %2846 = vmatmul.mubr.msk.bf16.gmra.mxu0 %vm1003_vm1, %v3470_v29  ;;  %v921_v25 = vpack.c.bf16 %v841_v7, %v825_v51  ;;  %v904_v26 = vpack.c.bf16 %v808_v13, %v792_v48  ;;  %v807_v28 = vmax.f32 %v679_v49, 0.0  ;;  %v648_v34 = vadd.f32 %v3370_v50, %v320_v44 }
 0x1a7   : > { %1194 = vmatprep.mubr.bf16.mxu1 %v3192_v12  ;;  %1267 = vmatprep.mubr.bf16.mxu0 %v3192_v12  ;;  %v906_v31 = vpack.c.bf16 %v810_v20, %v794_v8  ;;  %v793_v38 = vmax.f32 %v3493_v10, 0.0  ;;  %v809_v39 = vmax.f32 %v3496_v55, 0.0  ;;  %v634_v40 = vadd.f32 %v3376_v9, %v306_v15  ;;  %v356_v15 = vld [vmem:[#allocation2 + $0x1e8] sm:$0xff] }
 0x1a8   : > { %v3505_v47 = vpack.c.bf16 %v807_v28, %v791_v14  ;;  %v650_v32 = vadd.f32 %v3370_v50, %v322_v22  ;;  %v631_v33 = vadd.f32 %v3376_v9, %v303_v23  ;;  %v647_v52 = vadd.f32 %v3370_v50, %v319_v24  ;;  %v340_v14 = vld [vmem:[#allocation2 + $0x168] sm:$0xff]  ;;  %v342_v22 = vld [vmem:[#allocation2 + $0x178] sm:$0xff] }
 0x1a9   : > { %v760_v59 = vmax.f32 %v3499_v21, 0.0  ;;  %v633_v60 = vadd.f32 %v3376_v9, %v305_v35  ;;  %v731_v0 = vadd.f32 %v3344_v58, %v403_v37  ;;  %v747_v2 = vadd.f32 %v3358_v17, %v419_v30  ;;  %v358_v35 = vld [vmem:[#allocation2 + $0x1f8] sm:$0xff] }
 0x1aa   : > { %v776_v3 = vmax.f32 %v648_v34, 0.0  ;;  %v748_v4 = vadd.f32 %v3358_v17, %v420_v42  ;;  %v733_v7 = vadd.f32 %v3344_v58, %v405_v43  ;;  %v749_v48 = vadd.f32 %v3358_v17, %v421_v45  ;;  %v341_v42 = vld [vmem:[#allocation2 + $0x170] sm:$0xff] }
 0x1ab   : > { %v649_v49 = vadd.f32 %v3370_v50, %v321_v53  ;;  %v750_v61 = vadd.f32 %v3358_v17, %v422_v54  ;;  %v859_v62 = vmax.f32 %v731_v0, 0.0  ;;  %v875_v8 = vmax.f32 %v747_v2, 0.0  ;;  %v357_v43 = vld [vmem:[#allocation2 + $0x1f0] sm:$0xff]  ;;  %v308_v53 = vld [vmem:[#allocation2 + $0x68] sm:$0xff]  ;;  %v310_v2 = vld [vmem:[#allocation2 + $0x78] sm:$0xff] }
 0x1ac   : > { %v861_v10 = vmax.f32 %v733_v7, 0.0  ;;  %v877_v55 = vmax.f32 %v749_v48, 0.0  ;;  %v759_v44 = vmax.f32 %v631_v33, 0.0  ;;  %v761_v51 = vmax.f32 %v633_v60, 0.0  ;;  %v324_v54 = vld [vmem:[#allocation2 + $0xe8] sm:$0xff]  ;;  %v326_v7 = vld [vmem:[#allocation2 + $0xf8] sm:$0xff] }
 0x1ad   : > { %v3528_v13 = vpack.c.bf16 %v875_v8, %v859_v62  ;;  %v905_v17 = vpack.c.bf16 %v809_v39, %v793_v38  ;;  %v876_v20 = vmax.f32 %v748_v4, 0.0  ;;  %v888_v23 = vpack.c.bf16 %v776_v3, %v760_v59  ;;  %v355_v38 = vld [vmem:[#allocation2 + $0x1e0] sm:$0xff] }
 0x1ae   : > { %2847 = vmatmul.mubr.msk.bf16.vlgmr.msra.gmra.mxu1 %vm1003_vm1, %v3399_v27  ;;  %2851 = vmatmul.mubr.msk.bf16.vlgmr.msra.gmra.mxu0 %vm1003_vm1, %v3399_v27  ;;  %v3530_v21 = vpack.c.bf16 %v877_v55, %v861_v10  ;;  %v775_v24 = vmax.f32 %v647_v52, 0.0  ;;  %v777_v28 = vmax.f32 %v649_v49, 0.0  ;;  %v878_v34 = vmax.f32 %v750_v61, 0.0  ;;  %v307_v8 = vld [vmem:[#allocation2 + $0x60] sm:$0xff] }
 0x1af   : > { %1317 = vmatpush1.bf16.msra.mxu1 %v3477_v46  ;;  %1390 = vmatpush1.bf16.msra.mxu0 %v937_v1  ;;  %v762_v46 = vmax.f32 %v634_v40, 0.0  ;;  %v732_v1 = vadd.f32 %v3344_v58, %v404_v63  ;;  %v668_v30 = vadd.f32 %v3364_v41, %v340_v14  ;;  %v670_v40 = vadd.f32 %v3364_v41, %v342_v22 }
 0x1b0   : > { %1318 = vmatprep.subr.bf16.mxu1 %v920_v11  ;;  %1391 = vmatprep.subr.bf16.mxu0 %v922_v18  ;;  %v734_v11 = vadd.f32 %v3344_v58, %v406_v5  ;;  %v778_v18 = vmax.f32 %v650_v32, 0.0  ;;  %v686_v52 = vadd.f32 %v3356_v16, %v358_v35  ;;  %v683_v0 = vadd.f32 %v3356_v16, %v355_v38 }
 0x1b1   : > { %1204 = vmatprep.mubr.bf16.mxu1 %v3192_v12  ;;  %1277 = vmatprep.mubr.bf16.mxu0 %v3192_v12  ;;  %v860_v37 = vmax.f32 %v732_v1, 0.0  ;;  %v796_v32 = vmax.f32 %v668_v30, 0.0  ;;  %v798_v60 = vmax.f32 %v670_v40, 0.0  ;;  %v669_v4 = vadd.f32 %v3364_v41, %v341_v42  ;;  %v374_v40 = vld [vmem:[#allocation2 + $0x278] sm:$0xff]  ;;  %v387_v42 = vld [vmem:[#allocation2 + $0x2e0] sm:$0xff] }
 0x1b2   : > { %v890_v58 = vpack.c.bf16 %v778_v18, %v762_v46  ;;  %v862_v39 = vmax.f32 %v734_v11, 0.0  ;;  %v814_v3 = vmax.f32 %v686_v52, 0.0  ;;  %v685_v5 = vadd.f32 %v3356_v16, %v357_v43  ;;  %v323_v46 = vld [vmem:[#allocation2 + $0xe0] sm:$0xff]  ;;  %v389_v43 = vld [vmem:[#allocation2 + $0x2f0] sm:$0xff] }
 0x1b3   : > { %1319 = vmatpush1.bf16.msra.mxu1 %v919_v19  ;;  %1392 = vmatpush1.bf16.msra.mxu0 %v921_v25  ;;  %v684_v19 = vadd.f32 %v3356_v16, %v356_v15  ;;  %v339_v25 = vld [vmem:[#allocation2 + $0x160] sm:$0xff]  ;;  %v940_v45 = vpack.c.bf16 %v876_v20, %v860_v37  ;;  %v811_v49 = vmax.f32 %v683_v0, 0.0  ;;  %v636_v61 = vadd.f32 %v3376_v9, %v308_v53  ;;  %v373_v52 = vld [vmem:[#allocation2 + $0x270] sm:$0xff] }
 0x1b4   : > { %1320 = vmatprep.subr.bf16.mxu1 %v904_v26  ;;  %1393 = vmatprep.subr.bf16.mxu0 %v906_v31  ;;  %v887_v26 = vpack.c.bf16 %v775_v24, %v759_v44  ;;  %v889_v31 = vpack.c.bf16 %v777_v28, %v761_v51  ;;  %v942_v59 = vpack.c.bf16 %v878_v34, %v862_v39  ;;  %v797_v10 = vmax.f32 %v669_v4, 0.0  ;;  %v325_v51 = vld [vmem:[#allocation2 + $0xf0] sm:$0xff]  ;;  %v372_v39 = vld [vmem:[#allocation2 + $0x268] sm:$0xff] }
 0x1b5   : > { %v812_v33 = vmax.f32 %v684_v19, 0.0  ;;  %v667_v63 = vadd.f32 %v3364_v41, %v339_v25  ;;  %v652_v62 = vadd.f32 %v3370_v50, %v324_v54  ;;  %v3551_v1 = vpack.c.bf16 %v814_v3, %v798_v60  ;;  %v309_v41 = vld [vmem:[#allocation2 + $0x70] sm:$0xff] }
 0x1b6   : > { %2848 = vmatmul.mubr.msk.bf16.gmra.mxu1 %vm1003_vm1, %v3430_v56  ;;  %2852 = vmatmul.mubr.msk.bf16.gmra.mxu0 %vm1003_vm1, %v3430_v56  ;;  %v813_v55 = vmax.f32 %v685_v5, 0.0  ;;  %v638_v44 = vadd.f32 %v3376_v9, %v310_v2  ;;  %v764_v11 = vmax.f32 %v636_v61, 0.0  ;;  %v654_v15 = vadd.f32 %v3370_v50, %v326_v7 }
 0x1b7   : > { %1321 = vmatpush1.bf16.msra.mxu1 %v3505_v47  ;;  %1394 = vmatpush1.bf16.msra.mxu0 %v905_v17  ;;  %v3545_v47 = vpack.c.bf16 %v812_v33, %v796_v32  ;;  %v795_v48 = vmax.f32 %v667_v63, 0.0  ;;  %v780_v14 = vmax.f32 %v652_v62, 0.0  ;;  %v635_v20 = vadd.f32 %v3376_v9, %v307_v8  ;;  %v371_v33 = vld [vmem:[#allocation2 + $0x260] sm:$0xff] }
 0x1b8   : > { %1322 = vmatprep.subr.bf16.mxu1 %v888_v23  ;;  %1395 = vmatprep.subr.bf16.mxu0 %v890_v58  ;;  %v3557_v17 = vpack.c.bf16 %v813_v55, %v797_v10  ;;  %v766_v18 = vmax.f32 %v638_v44, 0.0  ;;  %v651_v22 = vadd.f32 %v3370_v50, %v323_v46  ;;  %v782_v24 = vmax.f32 %v654_v15, 0.0  ;;  %v3645_v46 = vpop.permute.xlu1 %980 }
 0x1b9   : > { %1214 = vmatprep.mubr.bf16.mxu1 %v3192_v12  ;;  %1287 = vmatprep.mubr.bf16.mxu0 %v3192_v12  ;;  %v3554_v16 = vpack.c.bf16 %v811_v49, %v795_v48  ;;  %v892_v23 = vpack.c.bf16 %v780_v14, %v764_v11  ;;  %v637_v28 = vadd.f32 %v3376_v9, %v309_v41  ;;  %v763_v35 = vmax.f32 %v635_v20, 0.0 }
 0x1ba   : > { %v653_v34 = vadd.f32 %v3370_v50, %v325_v51  ;;  %v779_v58 = vmax.f32 %v651_v22, 0.0  ;;  %v894_v37 = vpack.c.bf16 %v782_v24, %v766_v18  ;;  %v702_v32 = vadd.f32 %v3324_v36, %v374_v40 }
 0x1bb   : > { %1323 = vmatpush1.bf16.msra.mxu1 %v887_v26  ;;  %1396 = vmatpush1.bf16.msra.mxu0 %v889_v31  ;;  %v765_v30 = vmax.f32 %v637_v28, 0.0  ;;  %v388_v26 = vld [vmem:[#allocation2 + $0x2e8] sm:$0xff]  ;;  %v390_v31 = vld [vmem:[#allocation2 + $0x2f8] sm:$0xff]  ;;  %v715_v53 = vadd.f32 %v3342_v57, %v387_v42  ;;  %v717_v54 = vadd.f32 %v3342_v57, %v389_v43  ;;  %v699_v63 = vadd.f32 %v3324_v36, %v371_v33 }
 0x1bc   : > { %1462 = vmatprep.subr.bf16.mxu1 %v940_v45  ;;  %1535 = vmatprep.subr.bf16.mxu0 %v942_v59  ;;  %v781_v19 = vmax.f32 %v653_v34, 0.0  ;;  %v891_v25 = vpack.c.bf16 %v779_v58, %v763_v35  ;;  %v716_v50 = vadd.f32 %v3342_v57, %v388_v26  ;;  %v718_v9 = vadd.f32 %v3342_v57, %v390_v31 }
 0x1bd   : > { %v700_v45 = vadd.f32 %v3324_v36, %v372_v39  ;;  %v701_v0 = vadd.f32 %v3324_v36, %v373_v52  ;;  %v830_v3 = vmax.f32 %v702_v32, 0.0  ;;  %v843_v4 = vmax.f32 %v715_v53, 0.0 }
 0x1be   : > { %2849 = vmatmul.mubr.msk.bf16.gmra.mxu1 %vm1003_vm1, %v3453_v6  ;;  %2853 = vmatmul.mubr.msk.bf16.gmra.mxu0 %vm1003_vm1, %v3453_v6  ;;  %v893_v38 = vpack.c.bf16 %v781_v19, %v765_v30  ;;  %v844_v59 = vmax.f32 %v716_v50, 0.0  ;;  %v846_v60 = vmax.f32 %v718_v9, 0.0  ;;  %v845_v5 = vmax.f32 %v717_v54, 0.0 }
 0x1bf   : > { %1224 = vmatprep.mubr.bf16.mxu1 %v3192_v12  ;;  %1297 = vmatprep.mubr.bf16.mxu0 %v3192_v12  ;;  %v828_v2 = vmax.f32 %v700_v45, 0.0  ;;  %v827_v57 = vmax.f32 %v699_v63, 0.0  ;;  %v829_v49 = vmax.f32 %v701_v0, 0.0 }
 0x1c0   : > { %v926_v48 = vpack.c.bf16 %v846_v60, %v830_v3 }
 0x1c1   : > { %v924_v7 = vpack.c.bf16 %v844_v59, %v828_v2  ;;  %v923_v36 = vpack.c.bf16 %v843_v4, %v827_v57  ;;  %v925_v61 = vpack.c.bf16 %v845_v5, %v829_v49 }
 0x1c6   : > { %2850 = vmatmul.mubr.msk.bf16.gmra.mxu1 %vm1003_vm1, %v3470_v29  ;;  %2854 = vmatmul.mubr.msk.bf16.gmra.mxu0 %vm1003_vm1, %v3470_v29 }
 0x1c7   : > { %1340 = vmatprep.mubr.bf16.mxu1 %v3192_v12  ;;  %1413 = vmatprep.mubr.bf16.mxu0 %v3192_v12 }
 0x1ce   : > { %2855 = vmatmul.mubr.msk.bf16.vlgmr.msra.gmra.mxu1 %vm1003_vm1, %v3399_v27  ;;  %2859 = vmatmul.mubr.msk.bf16.vlgmr.msra.gmra.mxu0 %vm1003_vm1, %v3399_v27 }
 0x1cf   : > { %1463 = vmatpush1.bf16.msra.mxu1 %v3528_v13  ;;  %1536 = vmatpush1.bf16.msra.mxu0 %v3530_v21 }
 0x1d0   : > { %1464 = vmatprep.subr.bf16.mxu1 %v924_v7  ;;  %1537 = vmatprep.subr.bf16.mxu0 %v926_v48 }
 0x1d1   : > { %1350 = vmatprep.mubr.bf16.mxu1 %v3192_v12  ;;  %1423 = vmatprep.mubr.bf16.mxu0 %v3192_v12 }
 0x1d3   : > { %1465 = vmatpush1.bf16.msra.mxu1 %v923_v36  ;;  %1538 = vmatpush1.bf16.msra.mxu0 %v925_v61 }
 0x1d4   : > { %1466 = vmatprep.subr.bf16.mxu1 %v3545_v47  ;;  %1539 = vmatprep.subr.bf16.mxu0 %v3551_v1  ;;  %v3647_v1 = vpop.permute.xlu0 %975 }
 0x1d6   : > { %2856 = vmatmul.mubr.msk.bf16.gmra.mxu1 %vm1003_vm1, %v3430_v56  ;;  %2860 = vmatmul.mubr.msk.bf16.gmra.mxu0 %vm1003_vm1, %v3430_v56 }
 0x1d7   : > { %1467 = vmatpush1.bf16.msra.mxu1 %v3554_v16  ;;  %1540 = vmatpush1.bf16.msra.mxu0 %v3557_v17  ;;  %v3653_v16 = vpop.permute.xlu1 %970 }
 0x1d8   : > { %1468 = vmatprep.subr.bf16.mxu1 %v892_v23  ;;  %1541 = vmatprep.subr.bf16.mxu0 %v894_v37  ;;  %v3655_v11 = vpop.permute.xlu0 %965 }
 0x1d9   : > { %1360 = vmatprep.mubr.bf16.mxu1 %v3192_v12  ;;  %1433 = vmatprep.mubr.bf16.mxu0 %v3192_v12 }
 0x1db   : > { %1469 = vmatpush1.bf16.msra.mxu1 %v891_v25  ;;  %1542 = vmatpush1.bf16.msra.mxu0 %v893_v38  ;;  %v3657_v23 = vpop.permute.xlu1 %960 }
 0x1dc   : > { %v3659_v24 = vpop.permute.xlu0 %955 }
 0x1de   : > { %2857 = vmatmul.mubr.msk.bf16.gmra.mxu1 %vm1003_vm1, %v3453_v6  ;;  %2861 = vmatmul.mubr.msk.bf16.gmra.mxu0 %vm1003_vm1, %v3453_v6 }
 0x1df   : > { %1370 = vmatprep.mubr.bf16.mxu1 %v3192_v12  ;;  %1443 = vmatprep.mubr.bf16.mxu0 %v3192_v12  ;;  %v3661_v19 = vpop.permute.xlu1 %950 }
 0x1e0   : > { %v3663_v25 = vpop.permute.xlu0 %945 }
 0x1e6   : > { %2858 = vmatmul.mubr.msk.bf16.gmra.mxu1 %vm1003_vm1, %v3470_v29  ;;  %2862 = vmatmul.mubr.msk.bf16.gmra.mxu0 %vm1003_vm1, %v3470_v29 }
 0x1e7   : > { %1486 = vmatprep.mubr.bf16.mxu1 %v3192_v12  ;;  %1559 = vmatprep.mubr.bf16.mxu0 %v3192_v12 }
 0x1ee   : > { %2863 = vmatmul.mubr.msk.bf16.vlgmr.msra.gmra.mxu1 %vm1003_vm1, %v3399_v27  ;;  %2867 = vmatmul.mubr.msk.bf16.vlgmr.msra.gmra.mxu0 %vm1003_vm1, %v3399_v27 }
 0x1ef   : > { %1496 = vmatprep.mubr.bf16.mxu1 %v3192_v12  ;;  %1569 = vmatprep.mubr.bf16.mxu0 %v3192_v12 }
 0x1f6   : > { %2864 = vmatmul.mubr.msk.bf16.gmra.mxu1 %vm1003_vm1, %v3430_v56  ;;  %2868 = vmatmul.mubr.msk.bf16.gmra.mxu0 %vm1003_vm1, %v3430_v56 }
 0x1f7   : > { %1506 = vmatprep.mubr.bf16.mxu1 %v3192_v12  ;;  %1579 = vmatprep.mubr.bf16.mxu0 %v3192_v12 }
 0x1fe   : > { %2865 = vmatmul.mubr.msk.bf16.gmra.mxu1 %vm1003_vm1, %v3453_v6  ;;  %2869 = vmatmul.mubr.msk.bf16.gmra.mxu0 %vm1003_vm1, %v3453_v6 }
 0x1ff   : > { %1516 = vmatprep.mubr.bf16.mxu1 %v3192_v12  ;;  %1589 = vmatprep.mubr.bf16.mxu0 %v3192_v12 }
 0x206   : > { %2866 = vmatmul.mubr.msk.bf16.gmra.mxu1 %vm1003_vm1, %v3470_v29  ;;  %2870 = vmatmul.mubr.msk.bf16.gmra.mxu0 %vm1003_vm1, %v3470_v29 }
 0x207   : > { %1832 = vmatprep.mubr.bf16.mxu1 %v3192_v12  ;;  %1873 = vmatprep.mubr.bf16.mxu0 %v3192_v12 }
 0x24e   : > { %v3637_v27 = vpop.f32.mrf.mxu1  ;;  %v3639_v56 = vpop.f32.mrf.mxu0 }
 0x250   : > { %v1052_v13 = vpop.f32.mrf.mxu1  ;;  %v1125_v6 = vpop.f32.mrf.mxu0 }
 0x251   : > { %v3666_v38 = vadd.f32 %v1052_v13, %v3663_v25  ;;  %v3669_v26 = vadd.f32 %v1125_v6, %v3663_v25 }
 0x252   : > { %v3641_v21 = vpop.f32.mrf.mxu1  ;;  %v3643_v47 = vpop.f32.mrf.mxu0 }
 0x254   : > { %v1056_v62 = vpop.f32.mrf.mxu1  ;;  %v1129_v8 = vpop.f32.mrf.mxu0 }
 0x255   : > { %v3672_v31 = vadd.f32 %v1056_v62, %v3661_v19  ;;  %v3675_v39 = vadd.f32 %v1129_v8, %v3661_v19 }
 0x256   : > { %v3649_v29 = vpop.f32.mrf.mxu1  ;;  %v3651_v10 = vpop.f32.mrf.mxu0 }
 0x258   : > { %v1062_v55 = vpop.f32.mrf.mxu1  ;;  %v1135_v44 = vpop.f32.mrf.mxu0 }
 0x259   : > { %v3678_v9 = vadd.f32 %v1062_v55, %v3659_v24  ;;  %v3681_v42 = vadd.f32 %v1135_v44, %v3659_v24 }
 0x25a   : > { %v1064_v41 = vpop.f32.mrf.mxu1  ;;  %v1137_v51 = vpop.f32.mrf.mxu0 }
 0x25b   : > { %v3684_v43 = vadd.f32 %v1064_v41, %v3657_v23  ;;  %v3687_v45 = vadd.f32 %v1137_v51, %v3657_v23 }
 0x25c   : > { %v1066_v14 = vpop.f32.mrf.mxu1  ;;  %v1139_v15 = vpop.f32.mrf.mxu0 }
 0x25d   : > { %v3690_v32 = vadd.f32 %v1066_v14, %v3657_v23  ;;  %v3693_v33 = vadd.f32 %v1139_v15, %v3657_v23 }
 0x25e   : > { %v1070_v17 = vpop.f32.mrf.mxu1  ;;  %v1143_v18 = vpop.f32.mrf.mxu0 }
 0x260   : > { %v1072_v20 = vpop.f32.mrf.mxu1  ;;  %v1145_v22 = vpop.f32.mrf.mxu0 }
 0x261   : > { %v1073_v3 = vadd.f32 %v1072_v20, %v3655_v11  ;;  %v1146_v4 = vadd.f32 %v1145_v22, %v3655_v11  ;;  %v1071_v22 = vadd.f32 %v1070_v17, %v3655_v11  ;;  %v1061_v17 = vadd.f32 %v3649_v29, %v3659_v24 }
 0x262   : > { %v1074_v28 = vpop.f32.mrf.mxu1  ;;  %v1147_v34 = vpop.f32.mrf.mxu0  ;;  %v1055_v29 = vadd.f32 %v3641_v21, %v3661_v19  ;;  %v1051_v21 = vadd.f32 %v3637_v27, %v3663_v25 }
 0x263   : > { %v1075_v49 = vadd.f32 %v1074_v28, %v3653_v16  ;;  %v1148_v36 = vadd.f32 %v1147_v34, %v3653_v16  ;;  %v1144_v28 = vadd.f32 %v1143_v18, %v3655_v11  ;;  %v1649_v18 = vmax.f32 %v3690_v32, 0.0 }
 0x264   : > { %v1076_v35 = vpop.f32.mrf.mxu1  ;;  %v1149_v58 = vpop.f32.mrf.mxu0  ;;  %v1128_v32 = vadd.f32 %v3643_v47, %v3661_v19  ;;  %v1617_v47 = vmax.f32 %v3672_v31, 0.0  ;;  %v1616_v27 = vmax.f32 %v1055_v29, 0.0 }
 0x265   : > { %v1077_v52 = vadd.f32 %v1076_v35, %v3653_v16  ;;  %v1150_v53 = vadd.f32 %v1149_v58, %v3653_v16 }
 0x266   : > { %v1080_v37 = vpop.f32.mrf.mxu1  ;;  %v1153_v30 = vpop.f32.mrf.mxu0  ;;  %v1618_v31 = vmax.f32 %v1128_v32, 0.0 }
 0x267   : > { %v1081_v5 = vadd.f32 %v1080_v37, %v3647_v1  ;;  %v1154_v7 = vadd.f32 %v1153_v30, %v3647_v1  ;;  %v1681_v6 = vmax.f32 %v1077_v52, 0.0  ;;  %v1683_v62 = vmax.f32 %v1150_v53, 0.0 }
 0x268   : > { %v1082_v40 = vpop.f32.mrf.mxu1  ;;  %v1155_v50 = vpop.f32.mrf.mxu0  ;;  %v1665_v30 = vmax.f32 %v1073_v3, 0.0  ;;  %v1680_v53 = vmax.f32 %v1075_v49, 0.0  ;;  %v1134_v3 = vadd.f32 %v3651_v10, %v3659_v24  ;;  %v1635_v10 = vmax.f32 %v3681_v42, 0.0 }
 0x269   : > { %v1083_v60 = vadd.f32 %v1082_v40, %v3647_v1  ;;  %v1156_v63 = vadd.f32 %v1155_v50, %v3647_v1  ;;  %v1696_v34 = vmax.f32 %v1081_v5, 0.0  ;;  %v1698_v35 = vmax.f32 %v1154_v7, 0.0 }
 0x26a   : > { %v1084_v54 = vpop.f32.mrf.mxu1  ;;  %v1157_v59 = vpop.f32.mrf.mxu0  ;;  %v1667_v40 = vmax.f32 %v1146_v4, 0.0  ;;  %v1651_v4 = vmax.f32 %v3693_v33, 0.0  ;;  %v1664_v7 = vmax.f32 %v1071_v22, 0.0  ;;  %v1648_v33 = vmax.f32 %v3684_v43, 0.0 }
 0x26b   : > { %v1085_v0 = vadd.f32 %v1084_v54, %v3645_v46  ;;  %v1158_v2 = vadd.f32 %v1157_v59, %v3645_v46  ;;  %v1697_v51 = vmax.f32 %v1083_v60, 0.0  ;;  %v1699_v14 = vmax.f32 %v1156_v63, 0.0 }
 0x26c   : > { %v1086_v48 = vpop.f32.mrf.mxu1  ;;  %v1159_v57 = vpop.f32.mrf.mxu0  ;;  %v1682_v54 = vmax.f32 %v1148_v36, 0.0  ;;  %v1763_v5 = vpack.c.bf16 %v1683_v62, %v1667_v40  ;;  %v1633_v36 = vmax.f32 %v3678_v9, 0.0  ;;  %v1619_v9 = vmax.f32 %v3675_v39, 0.0 }
 0x26d   : > { %v1087_v61 = vadd.f32 %v1086_v48, %v3645_v46  ;;  %v1160_v13 = vadd.f32 %v1159_v57, %v3645_v46  ;;  %v1712_v8 = vmax.f32 %v1085_v0, 0.0  ;;  %v1714_v55 = vmax.f32 %v1158_v2, 0.0 }
 0x26e   : > { %v3709_v44 = vpop.f32.mrf.mxu1  ;;  %v3711_v41 = vpop.f32.mrf.mxu0  ;;  %v1761_v2 = vpack.c.bf16 %v1681_v6, %v1665_v30  ;;  %v1666_v48 = vmax.f32 %v1144_v28, 0.0  ;;  %v1745_v42 = vpack.c.bf16 %v1649_v18, %v1633_v36  ;;  %v1632_v43 = vmax.f32 %v1061_v17, 0.0  ;;  %v3756_v18 = vld [vmem:[%s4476_s5] sm:$0xf] }
 0x26f   : > { %v1713_v15 = vmax.f32 %v1087_v61, 0.0  ;;  %v1715_v20 = vmax.f32 %v1160_v13, 0.0  ;;  %v1776_v59 = vpack.c.bf16 %v1712_v8, %v1696_v34  ;;  %v1778_v60 = vpack.c.bf16 %v1714_v55, %v1698_v35 }
 0x270   : > { %v3715_v58 = vpop.f32.mrf.mxu1  ;;  %v3717_v37 = vpop.f32.mrf.mxu0  ;;  %v1650_v61 = vmax.f32 %v3687_v45, 0.0  ;;  %v1760_v13 = vpack.c.bf16 %v1680_v53, %v1664_v7  ;;  %v1762_v6 = vpack.c.bf16 %v1682_v54, %v1666_v48  ;;  %v1124_v55 = vadd.f32 %v3639_v56, %v3663_v25 }
 0x271   : > { %v1777_v50 = vpack.c.bf16 %v1713_v15, %v1697_v51  ;;  %v1779_v52 = vpack.c.bf16 %v1715_v20, %v1699_v14  ;;  %v1634_v51 = vmax.f32 %v1134_v3, 0.0  ;;  %v1747_v45 = vpack.c.bf16 %v1651_v4, %v1635_v10 }
 0x272   : > { %v3719_v63 = vpop.f32.mrf.mxu1  ;;  %v3721_v0 = vpop.f32.mrf.mxu0  ;;  %v1601_v20 = vmax.f32 %v3666_v38, 0.0  ;;  %v1603_v22 = vmax.f32 %v3669_v26, 0.0  ;;  %v1744_v28 = vpack.c.bf16 %v1648_v33, %v1632_v43  ;;  %v1600_v40 = vmax.f32 %v1051_v21, 0.0 }
 0x273   : > { %1808 = vmatprep.subr.bf16.mxu1 %v1777_v50  ;;  %1849 = vmatprep.subr.bf16.mxu0 %v1779_v52  ;;  %v1746_v39 = vpack.c.bf16 %v1650_v61, %v1634_v51  ;;  %v1602_v50 = vmax.f32 %v1124_v55, 0.0  ;;  %v3766_v29 = vadd.f32 %v3715_v58, %v3663_v25  ;;  %v3770_v32 = vadd.f32 %v3717_v37, %v3663_v25 }
 0x274   : > { %v3729_v57 = vpop.f32.mrf.mxu1  ;;  %v3731_v49 = vpop.f32.mrf.mxu0  ;;  %1809 = vmatpush1.bf16.msra.mxu1 %v1776_v59  ;;  %1850 = vmatpush1.bf16.msra.mxu0 %v1778_v60  ;;  %v1729_v56 = vpack.c.bf16 %v1617_v47, %v1601_v20  ;;  %v1731_v30 = vpack.c.bf16 %v1619_v9, %v1603_v22  ;;  %v1728_v38 = vpack.c.bf16 %v1616_v27, %v1600_v40 }
 0x275   : > { %1810 = vmatprep.subr.bf16.mxu1 %v1761_v2  ;;  %1851 = vmatprep.subr.bf16.mxu0 %v1763_v5  ;;  %v1730_v26 = vpack.c.bf16 %v1618_v31, %v1602_v50  ;;  %v3774_v36 = vadd.f32 %v3729_v57, %v3661_v19  ;;  %v3778_v10 = vadd.f32 %v3731_v49, %v3661_v19 }
 0x276   : > { %v3741_v62 = vpop.f32.mrf.mxu1  ;;  %v3743_v8 = vpop.f32.mrf.mxu0 }
 0x278   : > { %v1208_v14 = vpop.f32.mrf.mxu1  ;;  %v1281_v15 = vpop.f32.mrf.mxu0  ;;  %1811 = vmatpush1.bf16.msra.mxu1 %v1760_v13  ;;  %1852 = vmatpush1.bf16.msra.mxu0 %v1762_v6 }
 0x279   : > { %1812 = vmatprep.subr.bf16.mxu1 %v1745_v42  ;;  %1853 = vmatprep.subr.bf16.mxu0 %v1747_v45  ;;  %v3781_v13 = vadd.f32 %v1208_v14, %v3659_v24  ;;  %v3784_v58 = vadd.f32 %v1281_v15, %v3659_v24 }
 0x27a   : > { %v1210_v34 = vpop.f32.mrf.mxu1  ;;  %v1283_v35 = vpop.f32.mrf.mxu0 }
 0x27b   : > { %v3787_v6 = vadd.f32 %v1210_v34, %v3657_v23  ;;  %v3790_v37 = vadd.f32 %v1283_v35, %v3657_v23 }
 0x27c   : > { %v1212_v52 = vpop.f32.mrf.mxu1  ;;  %v1285_v53 = vpop.f32.mrf.mxu0  ;;  %1813 = vmatpush1.bf16.msra.mxu1 %v1744_v28  ;;  %1854 = vmatpush1.bf16.msra.mxu0 %v1746_v39 }
 0x27d   : > { %1814 = vmatprep.subr.bf16.mxu1 %v1729_v56  ;;  %1855 = vmatprep.subr.bf16.mxu0 %v1731_v30  ;;  %v3793_v57 = vadd.f32 %v1212_v52, %v3657_v23  ;;  %v3796_v49 = vadd.f32 %v1285_v53, %v3657_v23 }
 0x27e   : > { %v1216_v54 = vpop.f32.mrf.mxu1  ;;  %v1289_v59 = vpop.f32.mrf.mxu0 }
 0x280   : > { %v1218_v60 = vpop.f32.mrf.mxu1  ;;  %v1291_v17 = vpop.f32.mrf.mxu0  ;;  %1815 = vmatpush1.bf16.msra.mxu1 %v1728_v38  ;;  %1856 = vmatpush1.bf16.msra.mxu0 %v1730_v26 }
 0x281   : > { %v1219_v14 = vadd.f32 %v1218_v60, %v3655_v11  ;;  %v1292_v15 = vadd.f32 %v1291_v17, %v3655_v11 }
 0x282   : > { %v1220_v2 = vpop.f32.mrf.mxu1  ;;  %v1293_v5 = vpop.f32.mrf.mxu0 }
 0x283   : > { %2871 = vmatmul.mubr.msk.bf16.vlgmr.msra.gmra.mxu1 %vm1003_vm1, %v3756_v18  ;;  %2872 = vmatmul.mubr.msk.bf16.vlgmr.msra.gmra.mxu0 %vm1003_vm1, %v3756_v18  ;;  %v1221_v28 = vadd.f32 %v1220_v2, %v3653_v16  ;;  %v1294_v39 = vadd.f32 %v1293_v5, %v3653_v16  ;;  %v1217_v2 = vadd.f32 %v1216_v54, %v3655_v11 }
 0x284   : > { %v1222_v3 = vpop.f32.mrf.mxu1  ;;  %v1295_v4 = vpop.f32.mrf.mxu0  ;;  %1914 = vmatprep.mubr.bf16.mxu1 %v3192_v12  ;;  %1955 = vmatprep.mubr.bf16.mxu0 %v3192_v12  ;;  %v1290_v5 = vadd.f32 %v1289_v59, %v3655_v11  ;;  %v1207_v54 = vadd.f32 %v3741_v62, %v3659_v24  ;;  %v1653_v59 = vmax.f32 %v3793_v57, 0.0  ;;  %v1201_v62 = vadd.f32 %v3719_v63, %v3661_v19 }
 0x285   : > { %v1223_v21 = vadd.f32 %v1222_v3, %v3653_v16  ;;  %v1296_v47 = vadd.f32 %v1295_v4, %v3653_v16  ;;  %v1274_v57 = vadd.f32 %v3721_v0, %v3661_v19  ;;  %v1197_v63 = vadd.f32 %v3709_v44, %v3663_v25 }
 0x286   : > { %v1226_v7 = vpop.f32.mrf.mxu1  ;;  %v1299_v48 = vpop.f32.mrf.mxu0  ;;  %v1621_v0 = vmax.f32 %v3774_v36, 0.0  ;;  %v1620_v44 = vmax.f32 %v1201_v62, 0.0 }
 0x287   : > { %v1227_v20 = vadd.f32 %v1226_v7, %v3647_v1  ;;  %v1300_v22 = vadd.f32 %v1299_v48, %v3647_v1  ;;  %v1685_v56 = vmax.f32 %v1223_v21, 0.0  ;;  %v1687_v30 = vmax.f32 %v1296_v47, 0.0 }
 0x288   : > { %v1228_v33 = vpop.f32.mrf.mxu1  ;;  %v1301_v61 = vpop.f32.mrf.mxu0  ;;  %v1622_v36 = vmax.f32 %v1274_v57, 0.0 }
 0x289   : > { %v1229_v55 = vadd.f32 %v1228_v33, %v3647_v1  ;;  %v1302_v43 = vadd.f32 %v1301_v61, %v3647_v1  ;;  %v1700_v3 = vmax.f32 %v1227_v20, 0.0  ;;  %v1702_v4 = vmax.f32 %v1300_v22, 0.0 }
 0x28a   : > { %v1230_v9 = vpop.f32.mrf.mxu1  ;;  %v1303_v42 = vpop.f32.mrf.mxu0  ;;  %v1669_v33 = vmax.f32 %v1219_v14, 0.0  ;;  %v1671_v61 = vmax.f32 %v1292_v15, 0.0  ;;  %v1280_v14 = vadd.f32 %v3743_v8, %v3659_v24  ;;  %v1655_v15 = vmax.f32 %v3796_v49, 0.0 }
 0x28b   : > { %v1231_v51 = vadd.f32 %v1230_v9, %v3645_v46  ;;  %v1304_v45 = vadd.f32 %v1303_v42, %v3645_v46  ;;  %v1701_v38 = vmax.f32 %v1229_v55, 0.0  ;;  %v1703_v26 = vmax.f32 %v1302_v43, 0.0 }
 0x28c   : > { %v1232_v27 = vpop.f32.mrf.mxu1  ;;  %v1305_v31 = vpop.f32.mrf.mxu0  ;;  %v1684_v9 = vmax.f32 %v1221_v28, 0.0  ;;  %v1686_v42 = vmax.f32 %v1294_v39, 0.0  ;;  %v1765_v20 = vpack.c.bf16 %v1685_v56, %v1669_v33  ;;  %v1767_v22 = vpack.c.bf16 %v1687_v30, %v1671_v61 }
 0x28d   : > { %v1233_v34 = vadd.f32 %v1232_v27, %v3645_v46  ;;  %v1306_v35 = vadd.f32 %v1305_v31, %v3645_v46  ;;  %v1716_v40 = vmax.f32 %v1231_v51, 0.0  ;;  %v1718_v50 = vmax.f32 %v1304_v45, 0.0 }
 0x28e   : > { %v3812_v52 = vpop.f32.mrf.mxu1  ;;  %v3814_v53 = vpop.f32.mrf.mxu0  ;;  %v1668_v27 = vmax.f32 %v1217_v2, 0.0  ;;  %v1670_v31 = vmax.f32 %v1290_v5, 0.0  ;;  %v1639_v8 = vmax.f32 %v3784_v58, 0.0  ;;  %v1652_v49 = vmax.f32 %v3787_v6, 0.0 }
 0x28f   : > { %v1717_v60 = vmax.f32 %v1233_v34, 0.0  ;;  %v1719_v17 = vmax.f32 %v1306_v35, 0.0  ;;  %v1780_v55 = vpack.c.bf16 %v1716_v40, %v1700_v3  ;;  %v1782_v43 = vpack.c.bf16 %v1718_v50, %v1702_v4 }
 0x290   : > { %v3818_v7 = vpop.f32.mrf.mxu1  ;;  %v3820_v48 = vpop.f32.mrf.mxu0  ;;  %v1637_v34 = vmax.f32 %v3781_v13, 0.0  ;;  %v1654_v35 = vmax.f32 %v3790_v37, 0.0  ;;  %v1764_v56 = vpack.c.bf16 %v1684_v9, %v1668_v27  ;;  %v1766_v30 = vpack.c.bf16 %v1686_v42, %v1670_v31 }
 0x291   : > { %v1781_v21 = vpack.c.bf16 %v1717_v60, %v1701_v38  ;;  %v1783_v47 = vpack.c.bf16 %v1719_v17, %v1703_v26  ;;  %v1623_v13 = vmax.f32 %v3778_v10, 0.0  ;;  %v1270_v38 = vadd.f32 %v3711_v41, %v3663_v25 }
 0x292   : > { %v3822_v51 = vpop.f32.mrf.mxu1  ;;  %v3824_v45 = vpop.f32.mrf.mxu0  ;;  %v1749_v58 = vpack.c.bf16 %v1653_v59, %v1637_v34  ;;  %v1636_v6 = vmax.f32 %v1207_v54, 0.0  ;;  %v1638_v26 = vmax.f32 %v1280_v14, 0.0  ;;  %v1751_v37 = vpack.c.bf16 %v1655_v15, %v1639_v8 }
 0x293   : > { %1890 = vmatprep.subr.bf16.mxu1 %v1781_v21  ;;  %1931 = vmatprep.subr.bf16.mxu0 %v1783_v47  ;;  %v1605_v2 = vmax.f32 %v3766_v29, 0.0  ;;  %v1607_v5 = vmax.f32 %v3770_v32, 0.0  ;;  %v1604_v21 = vmax.f32 %v1197_v63, 0.0  ;;  %v1606_v47 = vmax.f32 %v1270_v38, 0.0 }
 0x294   : > { %v3832_v28 = vpop.f32.mrf.mxu1  ;;  %v3834_v39 = vpop.f32.mrf.mxu0  ;;  %1891 = vmatpush1.bf16.msra.mxu1 %v1780_v55  ;;  %1932 = vmatpush1.bf16.msra.mxu0 %v1782_v43  ;;  %v1748_v3 = vpack.c.bf16 %v1652_v49, %v1636_v6  ;;  %v1750_v10 = vpack.c.bf16 %v1654_v35, %v1638_v26  ;;  %v3864_v62 = vadd.f32 %v3818_v7, %v3663_v25 }
 0x295   : > { %1892 = vmatprep.subr.bf16.mxu1 %v1765_v20  ;;  %1933 = vmatprep.subr.bf16.mxu0 %v1767_v22  ;;  %v1733_v41 = vpack.c.bf16 %v1621_v0, %v1605_v2  ;;  %v1735_v61 = vpack.c.bf16 %v1623_v13, %v1607_v5  ;;  %v1732_v29 = vpack.c.bf16 %v1620_v44, %v1604_v21 }
 0x296   : > { %v3844_v40 = vpop.f32.mrf.mxu1  ;;  %v3846_v50 = vpop.f32.mrf.mxu0  ;;  %v1734_v32 = vpack.c.bf16 %v1622_v36, %v1606_v47  ;;  %v3868_v57 = vadd.f32 %v3820_v48, %v3663_v25  ;;  %v3872_v34 = vadd.f32 %v3832_v28, %v3661_v19  ;;  %v3876_v8 = vadd.f32 %v3834_v39, %v3661_v19 }
 0x298   : > { %v1354_v60 = vpop.f32.mrf.mxu1  ;;  %v1427_v17 = vpop.f32.mrf.mxu0  ;;  %1893 = vmatpush1.bf16.msra.mxu1 %v1764_v56  ;;  %1934 = vmatpush1.bf16.msra.mxu0 %v1766_v30 }
 0x299   : > { %1894 = vmatprep.subr.bf16.mxu1 %v1749_v58  ;;  %1935 = vmatprep.subr.bf16.mxu0 %v1751_v37  ;;  %v3879_v56 = vadd.f32 %v1354_v60, %v3659_v24  ;;  %v3882_v7 = vadd.f32 %v1427_v17, %v3659_v24 }
 0x29a   : > { %v1356_v4 = vpop.f32.mrf.mxu1  ;;  %v1429_v33 = vpop.f32.mrf.mxu0 }
 0x29b   : > { %v3885_v30 = vadd.f32 %v1356_v4, %v3657_v23  ;;  %v3888_v48 = vadd.f32 %v1429_v33, %v3657_v23 }
 0x29c   : > { %v1358_v9 = vpop.f32.mrf.mxu1  ;;  %v1431_v42 = vpop.f32.mrf.mxu0  ;;  %1895 = vmatpush1.bf16.msra.mxu1 %v1748_v3  ;;  %1936 = vmatpush1.bf16.msra.mxu0 %v1750_v10 }
 0x29d   : > { %1896 = vmatprep.subr.bf16.mxu1 %v1733_v41  ;;  %1937 = vmatprep.subr.bf16.mxu0 %v1735_v61  ;;  %v3891_v28 = vadd.f32 %v1358_v9, %v3657_v23  ;;  %v3894_v39 = vadd.f32 %v1431_v42, %v3657_v23 }
 0x29e   : > { %v1362_v55 = vpop.f32.mrf.mxu1  ;;  %v1435_v43 = vpop.f32.mrf.mxu0 }
 0x2a0   : > { %v1364_v54 = vpop.f32.mrf.mxu1  ;;  %v1437_v59 = vpop.f32.mrf.mxu0  ;;  %1897 = vmatpush1.bf16.msra.mxu1 %v1732_v29  ;;  %1938 = vmatpush1.bf16.msra.mxu0 %v1734_v32 }
 0x2a1   : > { %v1365_v60 = vadd.f32 %v1364_v54, %v3655_v11  ;;  %v1438_v17 = vadd.f32 %v1437_v59, %v3655_v11 }
 0x2a2   : > { %v1366_v20 = vpop.f32.mrf.mxu1  ;;  %v1439_v22 = vpop.f32.mrf.mxu0 }
 0x2a3   : > { %2873 = vmatmul.mubr.msk.bf16.vlgmr.msra.gmra.mxu1 %vm1003_vm1, %v3756_v18  ;;  %2874 = vmatmul.mubr.msk.bf16.vlgmr.msra.gmra.mxu0 %vm1003_vm1, %v3756_v18  ;;  %v1367_v3 = vadd.f32 %v1366_v20, %v3653_v16  ;;  %v1440_v10 = vadd.f32 %v1439_v22, %v3653_v16  ;;  %v1363_v20 = vadd.f32 %v1362_v55, %v3655_v11 }
 0x2a4   : > { %v1368_v14 = vpop.f32.mrf.mxu1  ;;  %v1441_v15 = vpop.f32.mrf.mxu0  ;;  %1996 = vmatprep.mubr.bf16.mxu1 %v3192_v12  ;;  %2037 = vmatprep.mubr.bf16.mxu0 %v3192_v12  ;;  %v1436_v22 = vadd.f32 %v1435_v43, %v3655_v11  ;;  %v1353_v55 = vadd.f32 %v3844_v40, %v3659_v24  ;;  %v1657_v43 = vmax.f32 %v3891_v28, 0.0  ;;  %v1347_v40 = vadd.f32 %v3822_v51, %v3661_v19 }
 0x2a5   : > { %v1369_v63 = vadd.f32 %v1368_v14, %v3653_v16  ;;  %v1442_v0 = vadd.f32 %v1441_v15, %v3653_v16  ;;  %v1420_v28 = vadd.f32 %v3824_v45, %v3661_v19  ;;  %v1343_v51 = vadd.f32 %v3812_v52, %v3663_v25 }
 0x2a6   : > { %v1372_v27 = vpop.f32.mrf.mxu1  ;;  %v1445_v31 = vpop.f32.mrf.mxu0  ;;  %v1625_v45 = vmax.f32 %v3872_v34, 0.0  ;;  %v1624_v52 = vmax.f32 %v1347_v40, 0.0 }
 0x2a7   : > { %v1373_v2 = vadd.f32 %v1372_v27, %v3647_v1  ;;  %v1446_v5 = vadd.f32 %v1445_v31, %v3647_v1  ;;  %v1689_v41 = vmax.f32 %v1369_v63, 0.0  ;;  %v1691_v61 = vmax.f32 %v1442_v0, 0.0 }
 0x2a8   : > { %v1374_v49 = vpop.f32.mrf.mxu1  ;;  %v1447_v35 = vpop.f32.mrf.mxu0  ;;  %v1626_v34 = vmax.f32 %v1420_v28, 0.0 }
 0x2a9   : > { %v1375_v38 = vadd.f32 %v1374_v49, %v3647_v1  ;;  %v1448_v6 = vadd.f32 %v1447_v35, %v3647_v1  ;;  %v1704_v14 = vmax.f32 %v1373_v2, 0.0  ;;  %v1706_v15 = vmax.f32 %v1446_v5, 0.0 }
 0x2aa   : > { %v1376_v13 = vpop.f32.mrf.mxu1  ;;  %v1449_v58 = vpop.f32.mrf.mxu0  ;;  %v1673_v49 = vmax.f32 %v1365_v60, 0.0  ;;  %v1675_v35 = vmax.f32 %v1438_v17, 0.0  ;;  %v1426_v60 = vadd.f32 %v3846_v50, %v3659_v24  ;;  %v1659_v17 = vmax.f32 %v3894_v39, 0.0 }
 0x2ab   : > { %v1377_v26 = vadd.f32 %v1376_v13, %v3645_v46  ;;  %v1450_v37 = vadd.f32 %v1449_v58, %v3645_v46  ;;  %v1705_v29 = vmax.f32 %v1375_v38, 0.0  ;;  %v1707_v32 = vmax.f32 %v1448_v6, 0.0 }
 0x2ac   : > { %v1378_v44 = vpop.f32.mrf.mxu1  ;;  %v1451_v36 = vpop.f32.mrf.mxu0  ;;  %v1688_v13 = vmax.f32 %v1367_v3, 0.0  ;;  %v1690_v58 = vmax.f32 %v1440_v10, 0.0  ;;  %v1769_v2 = vpack.c.bf16 %v1689_v41, %v1673_v49  ;;  %v1771_v5 = vpack.c.bf16 %v1691_v61, %v1675_v35 }
 0x2ad   : > { %v1379_v4 = vadd.f32 %v1378_v44, %v3645_v46  ;;  %v1452_v33 = vadd.f32 %v1451_v36, %v3645_v46  ;;  %v1720_v21 = vmax.f32 %v1377_v26, 0.0  ;;  %v1722_v47 = vmax.f32 %v1450_v37, 0.0 }
 0x2ae   : > { %v3910_v9 = vpop.f32.mrf.mxu1  ;;  %v3912_v42 = vpop.f32.mrf.mxu0  ;;  %v1672_v44 = vmax.f32 %v1363_v20, 0.0  ;;  %v1674_v36 = vmax.f32 %v1436_v22, 0.0  ;;  %v1643_v50 = vmax.f32 %v3882_v7, 0.0  ;;  %v1656_v39 = vmax.f32 %v3885_v30, 0.0 }
 0x2af   : > { %v1721_v54 = vmax.f32 %v1379_v4, 0.0  ;;  %v1723_v59 = vmax.f32 %v1452_v33, 0.0  ;;  %v1784_v38 = vpack.c.bf16 %v1720_v21, %v1704_v14  ;;  %v1786_v6 = vpack.c.bf16 %v1722_v47, %v1706_v15 }
 0x2b0   : > { %v3916_v27 = vpop.f32.mrf.mxu1  ;;  %v3918_v31 = vpop.f32.mrf.mxu0  ;;  %v1641_v4 = vmax.f32 %v3879_v56, 0.0  ;;  %v1658_v33 = vmax.f32 %v3888_v48, 0.0  ;;  %v1768_v41 = vpack.c.bf16 %v1688_v13, %v1672_v44  ;;  %v1770_v61 = vpack.c.bf16 %v1690_v58, %v1674_v36 }
 0x2b1   : > { %v1785_v63 = vpack.c.bf16 %v1721_v54, %v1705_v29  ;;  %v1787_v0 = vpack.c.bf16 %v1723_v59, %v1707_v32  ;;  %v1627_v56 = vmax.f32 %v3876_v8, 0.0  ;;  %v1416_v29 = vadd.f32 %v3814_v53, %v3663_v25 }
 0x2b2   : > { %v3920_v26 = vpop.f32.mrf.mxu1  ;;  %v3922_v37 = vpop.f32.mrf.mxu0  ;;  %v1753_v7 = vpack.c.bf16 %v1657_v43, %v1641_v4  ;;  %v1640_v30 = vmax.f32 %v1353_v55, 0.0  ;;  %v1642_v32 = vmax.f32 %v1426_v60, 0.0  ;;  %v1755_v48 = vpack.c.bf16 %v1659_v17, %v1643_v50 }
 0x2b3   : > { %1972 = vmatprep.subr.bf16.mxu1 %v1785_v63  ;;  %2013 = vmatprep.subr.bf16.mxu0 %v1787_v0  ;;  %v1609_v20 = vmax.f32 %v3864_v62, 0.0  ;;  %v1611_v22 = vmax.f32 %v3868_v57, 0.0  ;;  %v1608_v63 = vmax.f32 %v1343_v51, 0.0  ;;  %v1610_v0 = vmax.f32 %v1416_v29, 0.0 }
 0x2b4   : > { %v3930_v3 = vpop.f32.mrf.mxu1  ;;  %v3932_v10 = vpop.f32.mrf.mxu0  ;;  %1973 = vmatpush1.bf16.msra.mxu1 %v1784_v38  ;;  %2014 = vmatpush1.bf16.msra.mxu0 %v1786_v6  ;;  %v1752_v14 = vpack.c.bf16 %v1656_v39, %v1640_v30  ;;  %v1754_v8 = vpack.c.bf16 %v1658_v33, %v1642_v32  ;;  %v3962_v40 = vadd.f32 %v3916_v27, %v3663_v25 }
 0x2b5   : > { %1974 = vmatprep.subr.bf16.mxu1 %v1769_v2  ;;  %2015 = vmatprep.subr.bf16.mxu0 %v1771_v5  ;;  %v1737_v53 = vpack.c.bf16 %v1625_v45, %v1609_v20  ;;  %v1739_v35 = vpack.c.bf16 %v1627_v56, %v1611_v22  ;;  %v1736_v62 = vpack.c.bf16 %v1624_v52, %v1608_v63 }
 0x2b6   : > { %v3942_v21 = vpop.f32.mrf.mxu1  ;;  %v3944_v47 = vpop.f32.mrf.mxu0  ;;  %v1738_v57 = vpack.c.bf16 %v1626_v34, %v1610_v0  ;;  %v3966_v28 = vadd.f32 %v3918_v31, %v3663_v25  ;;  %v3970_v4 = vadd.f32 %v3930_v3, %v3661_v19  ;;  %v3974_v50 = vadd.f32 %v3932_v10, %v3661_v19 }
 0x2b8   : > { %v1500_v54 = vpop.f32.mrf.mxu1  ;;  %v1573_v59 = vpop.f32.mrf.mxu0  ;;  %1975 = vmatpush1.bf16.msra.mxu1 %v1768_v41  ;;  %2016 = vmatpush1.bf16.msra.mxu0 %v1770_v61 }
 0x2b9   : > { %1976 = vmatprep.subr.bf16.mxu1 %v1753_v7  ;;  %2017 = vmatprep.subr.bf16.mxu0 %v1755_v48  ;;  %v3977_v33 = vadd.f32 %v1500_v54, %v3659_v24  ;;  %v3980_v27 = vadd.f32 %v1573_v59, %v3659_v24 }
 0x2ba   : > { %v1502_v15 = vpop.f32.mrf.mxu1  ;;  %v1575_v49 = vpop.f32.mrf.mxu0 }
 0x2bb   : > { %v3983_v41 = vadd.f32 %v1502_v15, %v3657_v23  ;;  %v3986_v31 = vadd.f32 %v1575_v49, %v3657_v23 }
 0x2bc   : > { %v1504_v13 = vpop.f32.mrf.mxu1  ;;  %v1577_v58 = vpop.f32.mrf.mxu0  ;;  %1977 = vmatpush1.bf16.msra.mxu1 %v1752_v14  ;;  %2018 = vmatpush1.bf16.msra.mxu0 %v1754_v8 }
 0x2bd   : > { %1978 = vmatprep.subr.bf16.mxu1 %v1737_v53  ;;  %2019 = vmatprep.subr.bf16.mxu0 %v1739_v35  ;;  %v3989_v3 = vadd.f32 %v1504_v13, %v3657_v23  ;;  %v3992_v10 = vadd.f32 %v1577_v58, %v3657_v23 }
 0x2be   : > { %v1508_v38 = vpop.f32.mrf.mxu1  ;;  %v1581_v6 = vpop.f32.mrf.mxu0 }
 0x2c0   : > { %v1510_v55 = vpop.f32.mrf.mxu1  ;;  %v1583_v43 = vpop.f32.mrf.mxu0  ;;  %1979 = vmatpush1.bf16.msra.mxu1 %v1736_v62  ;;  %2020 = vmatpush1.bf16.msra.mxu0 %v1738_v57  ;;  %v1582_v62 = vadd.f32 %v1581_v6, %v3655_v11 }
 0x2c1   : > { %v1511_v48 = vadd.f32 %v1510_v55, %v3655_v11  ;;  %v1584_v54 = vadd.f32 %v1583_v43, %v3655_v11 }
 0x2c2   : > { %v1512_v2 = vpop.f32.mrf.mxu1  ;;  %v1585_v5 = vpop.f32.mrf.mxu0 }
 0x2c3   : > { %2875 = vmatmul.mubr.msk.bf16.vlgmr.msra.gmra.mxu1 %vm1003_vm1, %v3756_v18  ;;  %2876 = vmatmul.mubr.msk.bf16.vlgmr.msra.gmra.mxu0 %vm1003_vm1, %v3756_v18  ;;  %v1513_v52 = vadd.f32 %v1512_v2, %v3653_v16  ;;  %v1586_v34 = vadd.f32 %v1585_v5, %v3653_v16  ;;  %v1677_v43 = vmax.f32 %v1511_v48, 0.0 }
 0x2c4   : > { %v1514_v60 = vpop.f32.mrf.mxu1  ;;  %v1587_v17 = vpop.f32.mrf.mxu0  ;;  %2078 = vmatprep.mubr.bf16.mxu1 %v3192_v12  ;;  %2119 = vmatprep.mubr.bf16.mxu0 %v3192_v12 }
 0x2c5   : > { %v1515_v61 = vadd.f32 %v1514_v60, %v3653_v16  ;;  %v1588_v51 = vadd.f32 %v1587_v17, %v3653_v16  ;;  %v1679_v16 = vmax.f32 %v1584_v54, 0.0  ;;  %v1692_v60 = vmax.f32 %v1513_v52, 0.0 }
 0x2c6   : > { %v1518_v44 = vpop.f32.mrf.mxu1  ;;  %v1591_v36 = vpop.f32.mrf.mxu0 }
 0x2c7   : > { %v1519_v23 = vadd.f32 %v1518_v44, %v3647_v1  ;;  %v1592_v59 = vadd.f32 %v1591_v36, %v3647_v1  ;;  %v1693_v15 = vmax.f32 %v1515_v61, 0.0  ;;  %v1695_v49 = vmax.f32 %v1588_v51, 0.0 }
 0x2c8   : > { %v1520_v39 = vpop.f32.mrf.mxu1  ;;  %v1593_v12 = vpop.f32.mrf.mxu0  ;;  %v1661_v36 = vmax.f32 %v3989_v3, 0.0  ;;  %v1678_v51 = vmax.f32 %v1582_v62, 0.0  ;;  %v1566_v3 = vadd.f32 %v3922_v37, %v3661_v19  ;;  %v1562_v37 = vadd.f32 %v3912_v42, %v3663_v25 }
 0x2c9   : > { %v1521_v7 = vadd.f32 %v1520_v39, %v3647_v1  ;;  %v1594_v29 = vadd.f32 %v1593_v12, %v3647_v1  ;;  %v1509_v1 = vadd.f32 %v1508_v38, %v3655_v11  ;;  %v1708_v57 = vmax.f32 %v1519_v23, 0.0 }
 0x2ca   : > { %v1522_v45 = vpop.f32.mrf.mxu1  ;;  %v1595_v56 = vpop.f32.mrf.mxu0  ;;  %v1710_v55 = vmax.f32 %v1592_v59, 0.0  ;;  %v1663_v39 = vmax.f32 %v3992_v10, 0.0  ;;  %v1773_v12 = vpack.c.bf16 %v1693_v15, %v1677_v43  ;;  %v1775_v61 = vpack.c.bf16 %v1695_v49, %v1679_v16 }
 0x2cb   : > { %v1523_v30 = vadd.f32 %v1522_v45, %v3645_v46  ;;  %v1596_v32 = vadd.f32 %v1595_v56, %v3645_v46  ;;  %v1709_v63 = vmax.f32 %v1521_v7, 0.0  ;;  %v1711_v0 = vmax.f32 %v1594_v29, 0.0 }
 0x2cc   : > { %v1524_v20 = vpop.f32.mrf.mxu1  ;;  %v1597_v22 = vpop.f32.mrf.mxu0  ;;  %v1499_v11 = vadd.f32 %v3942_v21, %v3659_v24  ;;  %v1572_v38 = vadd.f32 %v3944_v47, %v3659_v24  ;;  %v1676_v6 = vmax.f32 %v1509_v1, 0.0  ;;  %v1493_v45 = vadd.f32 %v3920_v26, %v3661_v19 }
 0x2cd   : > { %v1525_v14 = vadd.f32 %v1524_v20, %v3645_v46  ;;  %v1598_v8 = vadd.f32 %v1597_v22, %v3645_v46  ;;  %v1724_v53 = vmax.f32 %v1523_v30, 0.0  ;;  %v1726_v35 = vmax.f32 %v1596_v32, 0.0 }
 0x2ce   : > { %v1694_v46 = vmax.f32 %v1586_v34, 0.0  ;;  %v1645_v10 = vmax.f32 %v3977_v33, 0.0  ;;  %v1647_v56 = vmax.f32 %v3980_v27, 0.0  ;;  %v1660_v21 = vmax.f32 %v3983_v41, 0.0 }
 0x2cf   : > { %v1725_v13 = vmax.f32 %v1525_v14, 0.0  ;;  %v1727_v58 = vmax.f32 %v1598_v8, 0.0  ;;  %v1788_v17 = vpack.c.bf16 %v1724_v53, %v1708_v57  ;;  %v1790_v44 = vpack.c.bf16 %v1726_v35, %v1710_v55 }
 0x2d0   : > { %v1662_v24 = vmax.f32 %v3986_v31, 0.0  ;;  %v1772_v47 = vpack.c.bf16 %v1692_v60, %v1676_v6  ;;  %v1774_v7 = vpack.c.bf16 %v1694_v46, %v1678_v51  ;;  %v1629_v29 = vmax.f32 %v3970_v4, 0.0 }
 0x2d1   : > { %v1789_v2 = vpack.c.bf16 %v1725_v13, %v1709_v63  ;;  %v1791_v5 = vpack.c.bf16 %v1727_v58, %v1711_v0  ;;  %v1631_v30 = vmax.f32 %v3974_v50, 0.0  ;;  %v1757_v26 = vpack.c.bf16 %v1661_v36, %v1645_v10 }
 0x2d2   : > { %v1759_v32 = vpack.c.bf16 %v1663_v39, %v1647_v56  ;;  %v1489_v19 = vadd.f32 %v3910_v9, %v3663_v25  ;;  %v1644_v33 = vmax.f32 %v1499_v11, 0.0  ;;  %v1646_v27 = vmax.f32 %v1572_v38, 0.0 }
 0x2d3   : > { %2054 = vmatprep.subr.bf16.mxu1 %v1789_v2  ;;  %2095 = vmatprep.subr.bf16.mxu0 %v1791_v5  ;;  %v1613_v41 = vmax.f32 %v3962_v40, 0.0  ;;  %v1615_v31 = vmax.f32 %v3966_v28, 0.0  ;;  %v1628_v4 = vmax.f32 %v1493_v45, 0.0  ;;  %v1630_v50 = vmax.f32 %v1566_v3, 0.0  ;;  %v4036_v40 = vpop.permute.xlu0 %1794 }
 0x2d4   : > { %2055 = vmatpush1.bf16.msra.mxu1 %v1788_v17  ;;  %2096 = vmatpush1.bf16.msra.mxu0 %v1790_v44  ;;  %v1756_v48 = vpack.c.bf16 %v1660_v21, %v1644_v33  ;;  %v1758_v54 = vpack.c.bf16 %v1662_v24, %v1646_v27  ;;  %v1612_v9 = vmax.f32 %v1489_v19, 0.0  ;;  %v1614_v20 = vmax.f32 %v1562_v37, 0.0 }
 0x2d5   : > { %2056 = vmatprep.subr.bf16.mxu1 %v1773_v12  ;;  %2097 = vmatprep.subr.bf16.mxu0 %v1775_v61  ;;  %v1741_v23 = vpack.c.bf16 %v1629_v29, %v1613_v41  ;;  %v1743_v59 = vpack.c.bf16 %v1631_v30, %v1615_v31 }
 0x2d6   : > { %v1740_v25 = vpack.c.bf16 %v1628_v4, %v1612_v9  ;;  %v1742_v42 = vpack.c.bf16 %v1630_v50, %v1614_v20 }
 0x2d8   : > { %2057 = vmatpush1.bf16.msra.mxu1 %v1772_v47  ;;  %2098 = vmatpush1.bf16.msra.mxu0 %v1774_v7 }
 0x2d9   : > { %2058 = vmatprep.subr.bf16.mxu1 %v1757_v26  ;;  %2099 = vmatprep.subr.bf16.mxu0 %v1759_v32 }
 0x2dc   : > { %2059 = vmatpush1.bf16.msra.mxu1 %v1756_v48  ;;  %2100 = vmatpush1.bf16.msra.mxu0 %v1758_v54 }
 0x2dd   : > { %2060 = vmatprep.subr.bf16.mxu1 %v1741_v23  ;;  %2101 = vmatprep.subr.bf16.mxu0 %v1743_v59 }
 0x2e0   : > { %2061 = vmatpush1.bf16.msra.mxu1 %v1740_v25  ;;  %2102 = vmatpush1.bf16.msra.mxu0 %v1742_v42 }
 0x2e3   : > { %2877 = vmatmul.mubr.msk.bf16.vlgmr.msra.gmra.mxu1 %vm1003_vm1, %v3756_v18  ;;  %2878 = vmatmul.mubr.msk.bf16.vlgmr.msra.gmra.mxu0 %vm1003_vm1, %v3756_v18 }
 0x343   : > { %v1834_v28 = vpop.f32.mrf.mxu1  ;;  %v1875_v22 = vpop.f32.mrf.mxu0 }
 0x344   : > { %v4039_v52 = vadd.f32 %v1834_v28, %v4036_v40  ;;  %v4042_v34 = vadd.f32 %v1875_v22, %v4036_v40 }
 0x345   : > { %v1836_v14 = vpop.f32.mrf.mxu1  ;;  %v1877_v8 = vpop.f32.mrf.mxu0 }
 0x346   : > { %v2272_v15 = vand.u32 2147483647, %v4039_v52  ;;  %v2274_v49 = vand.u32 2147483647, %v4042_v34  ;;  %v4047_v18 = vadd.f32 %v1836_v14, %v4036_v40  ;;  %v4050_v0 = vadd.f32 %v1877_v8, %v4036_v40 }
 0x347   : > { %v1838_v53 = vpop.f32.mrf.mxu1  ;;  %v1879_v35 = vpop.f32.mrf.mxu0  ;;  %v2879_v38 = vmul.f32 -1.442695, %v4039_v52  ;;  %v2881_v45 = vmul.f32 -1.442695, %v4042_v34  ;;  %v2224_v3 = vmax.f32 %v4039_v52, 0.0  ;;  %v2226_v24 = vmax.f32 %v4042_v34, 0.0 }
 0x348   : > { %v2288_v63 = vsub.f32 0.0, %v2272_v15  ;;  %v2290_v13 = vsub.f32 0.0, %v2274_v49  ;;  %v2273_v55 = vand.u32 2147483647, %v4047_v18  ;;  %v2275_v43 = vand.u32 2147483647, %v4050_v0 }
 0x349   : > { %v1839_v58 = vpop.f32.mrf.mxu1  ;;  %v1880_v1 = vpop.f32.mrf.mxu0  ;;  %v2880_v10 = vmul.f32 -1.442695, %v4047_v18  ;;  %v2882_v47 = vmul.f32 -1.442695, %v4050_v0  ;;  %vm2240_vm2 = vcmp.ne.f32.partialorder %v4039_v52, %v4039_v52  ;;  %v2225_v33 = vmax.f32 %v4047_v18, 0.0 }
 0x34a   : > { %v2304_v62 = vmul.f32 1.442695, %v2288_v63  ;;  %v2308_v57 = vmul.f32 1.442695, %v2290_v13  ;;  %v2289_v16 = vsub.f32 0.0, %v2273_v55  ;;  %v2291_v2 = vsub.f32 0.0, %v2275_v43 }
 0x34b   : > { %v2227_v27 = vmax.f32 %v4050_v0, 0.0  ;;  %vm2242_vm3 = vcmp.ne.f32.partialorder %v4042_v34, %v4042_v34  ;;  %vm2241_vm8 = vcmp.ne.f32.partialorder %v4047_v18, %v4047_v18  ;;  %vm2243_vm9 = vcmp.ne.f32.partialorder %v4050_v0, %v4050_v0 }
 0x34c   : > { %2959 = vpow2.f32 %v2304_v62  ;;  %v2306_v5 = vmul.f32 1.442695, %v2289_v16  ;;  %v2310_v60 = vmul.f32 1.442695, %v2291_v2 }
 0x34d   : > { %2961 = vpow2.f32 %v2308_v57 }
 0x34e   : > { %2963 = vpow2.f32 %v2306_v5 }
 0x34f   : > { %2965 = vpow2.f32 %v2310_v60 }
 0x359   : > { %v2960_v46 = vpop.eup %2959 }
 0x35a   : > { %v4054_v17 = vpop.eup %2961  ;;  %v2336_v44 = vadd.f32 1.0, %v2960_v46  ;;  %v2339_v6 = vmul.f32 -0.5, %v2960_v46  ;;  %v2342_v26 = vand.u32 2147483647, %v2960_v46 }
 0x35b   : > { %v2354_v36 = vadd.f32 1.0, %v4054_v17  ;;  %v4057_v39 = vpop.eup %2963  ;;  %v2357_v51 = vmul.f32 -0.5, %v4054_v17  ;;  %v2360_v23 = vand.u32 2147483647, %v4054_v17 }
 0x35c   : > { %2967 = vlog2.f32 %v2336_v44  ;;  %v4059_v12 = vpop.eup %2965  ;;  %v2345_v61 = vadd.f32 1.0, %v4057_v39  ;;  %v2340_v30 = vadd.f32 1.0, %v2339_v6  ;;  %v2348_v31 = vmul.f32 -0.5, %v4057_v39 }
 0x35d   : > { %2969 = vlog2.f32 %v2354_v36  ;;  %v2363_v11 = vadd.f32 1.0, %v4059_v12  ;;  %v2358_v32 = vadd.f32 1.0, %v2357_v51  ;;  %v2366_v4 = vmul.f32 -0.5, %v4059_v12 }
 0x35e   : > { %2971 = vlog2.f32 %v2345_v61  ;;  %v2341_v25 = vmul.f32 %v2960_v46, %v2340_v30  ;;  %vm4090_vm4 = vcmp.lt.f32.partialorder %v2342_v26, 0.0004427343  ;;  %v2351_v53 = vand.u32 2147483647, %v4057_v39 }
 0x35f   : > { %2973 = vlog2.f32 %v2363_v11  ;;  %v2359_v28 = vmul.f32 %v4054_v17, %v2358_v32  ;;  %v2349_v58 = vadd.f32 1.0, %v2348_v31  ;;  %v2367_v1 = vadd.f32 1.0, %v2366_v4 }
 0x360   : > { %2975 = vpow2.f32 %v2879_v38  ;;  %vm2361_vm5 = vcmp.lt.f32.partialorder %v2360_v23, 0.0004427343  ;;  %v2369_v2 = vand.u32 2147483647, %v4059_v12  ;;  %vm4103_vm6 = vcmp.lt.f32.partialorder %v2351_v53, 0.0004427343 }
 0x361   : > { %2977 = vpow2.f32 %v2881_v45  ;;  %v2350_v38 = vmul.f32 %v4057_v39, %v2349_v58  ;;  %v2368_v6 = vmul.f32 %v4059_v12, %v2367_v1  ;;  %v2608_v23 = vlaneseq }
 0x362   : > { %2979 = vpow2.f32 %v2880_v10  ;;  %vm2370_vm7 = vcmp.lt.f32.partialorder %v2369_v2, 0.0004427343 }
 0x363   : > { %v1916_v56 = vpop.f32.mrf.mxu1  ;;  %v1957_v21 = vpop.f32.mrf.mxu0  ;;  %2981 = vpow2.f32 %v2882_v47 }
 0x364   : > { %v4071_v7 = vadd.f32 %v1916_v56, %v4036_v40  ;;  %v4074_v29 = vadd.f32 %v1957_v21, %v4036_v40 }
 0x365   : > { %v1918_v19 = vpop.f32.mrf.mxu1  ;;  %v1959_v37 = vpop.f32.mrf.mxu0 }
 0x366   : > { %v2276_v41 = vand.u32 2147483647, %v4071_v7  ;;  %v2278_v50 = vand.u32 2147483647, %v4074_v29  ;;  %v4088_v9 = vadd.f32 %v1918_v19, %v4036_v40  ;;  %v4097_v63 = vadd.f32 %v1959_v37, %v4036_v40 }
 0x367   : > { %v1920_v48 = vpop.f32.mrf.mxu1  ;;  %v1961_v54 = vpop.f32.mrf.mxu0  ;;  %vm2244_vm10 = vcmp.ne.f32.partialorder %v4071_v7, %v4071_v7  ;;  %vm2246_vm11 = vcmp.ne.f32.partialorder %v4074_v29, %v4074_v29 }
 0x368   : > { %v2292_v59 = vsub.f32 0.0, %v2276_v41  ;;  %v2294_v22 = vsub.f32 0.0, %v2278_v50  ;;  %v2277_v55 = vand.u32 2147483647, %v4088_v9  ;;  %v2279_v44 = vand.u32 2147483647, %v4097_v63 }
 0x369   : > { %v2968_v20 = vpop.eup %2967  ;;  %v1921_v14 = vpop.f32.mrf.mxu1  ;;  %v2886_v58 = vmul.f32 -1.442695, %v4097_v63  ;;  %vm2245_vm14 = vcmp.ne.f32.partialorder %v4088_v9, %v4088_v9  ;;  %vm2247_vm0 = vcmp.ne.f32.partialorder %v4097_v63, %v4097_v63 }
 0x36a   : > { %v1962_v8 = vpop.f32.mrf.mxu0  ;;  %v2970_v15 = vpop.eup %2969  ;;  %v2338_v49 = vmul.f32 0.6931472, %v2968_v20  ;;  %v2312_v35 = vmul.f32 1.442695, %v2292_v59  ;;  %v2316_v62 = vmul.f32 1.442695, %v2294_v22 }
 0x36b   : > { %v2356_v13 = vmul.f32 0.6931472, %v2970_v15  ;;  %v2972_v5 = vpop.eup %2971  ;;  %v2293_v17 = vsub.f32 0.0, %v2277_v55  ;;  %v2883_v59 = vmul.f32 -1.442695, %v4071_v7 }
 0x36c   : > { %v2344_v57 = vsel %vm4090_vm4, %v2341_v25, %v2338_v49  ;;  %2983 = vpow2.f32 %v2312_v35  ;;  %v2974_v36 = vpop.eup %2973  ;;  %v2347_v11 = vmul.f32 0.6931472, %v2972_v5  ;;  %v2885_v20 = vmul.f32 -1.442695, %v4074_v29 }
 0x36d   : > { %v2480_v43 = vadd.f32 %v2344_v57, %v2224_v3  ;;  %v2362_v16 = vsel %vm2361_vm5, %v2359_v28, %v2356_v13  ;;  %2985 = vpow2.f32 %v2316_v62  ;;  %v2365_v3 = vmul.f32 0.6931472, %v2974_v36 }
 0x36e   : > { %v2482_v60 = vadd.f32 %v2362_v16, %v2226_v24  ;;  %v2314_v10 = vmul.f32 1.442695, %v2293_v17  ;;  %v2353_v21 = vsel %vm4103_vm6, %v2350_v38, %v2347_v11  ;;  %v2295_v24 = vsub.f32 0.0, %v2279_v44 }
 0x36f   : > { %v2496_v61 = vsel %vm2240_vm2, %v4039_v52, %v2480_v43  ;;  %v2976_v52 = vpop.eup %2975  ;;  %v2481_v47 = vadd.f32 %v2353_v21, %v2225_v33  ;;  %v2371_v39 = vsel %vm2370_vm7, %v2368_v6, %v2365_v3  ;;  %v2884_v25 = vmul.f32 -1.442695, %v4088_v9 }
 0x370   : > { %v2512_v51 = vmul.f32 0.13571429, %v2496_v61  ;;  %v2498_v45 = vsel %vm2242_vm3, %v4042_v34, %v2482_v60  ;;  %v2978_v30 = vpop.eup %2977  ;;  %v2483_v12 = vadd.f32 %v2371_v39, %v2227_v27  ;;  %v2318_v26 = vmul.f32 1.442695, %v2295_v24 }
 0x371   : > { %v2514_v56 = vmul.f32 0.13571429, %v2498_v45  ;;  %v2980_v34 = vpop.eup %2979  ;;  %v2497_v32 = vsel %vm2241_vm8, %v4047_v18, %v2481_v47  ;;  %v2176_v37 = vadd.f32 1.0, %v2976_v52  ;;  %v2178_v31 = vadd.f32 1.0, %v2978_v30 }
 0x372   : > { %2987 = vtanh.f32 %v2512_v51  ;;  %v2982_v19 = vpop.eup %2981  ;;  %v2513_v41 = vmul.f32 0.13571429, %v2497_v32  ;;  %v2499_v33 = vsel %vm2243_vm9, %v4050_v0, %v2483_v12  ;;  %v2177_v50 = vadd.f32 1.0, %v2980_v34 }
 0x373   : > { %2989 = vtanh.f32 %v2514_v56  ;;  %v2515_v4 = vmul.f32 0.13571429, %v2499_v33  ;;  %v2179_v18 = vadd.f32 1.0, %v2982_v19  ;;  %v2609_v28 = vshrl.u32 %v2608_v23, 7 }
 0x374   : > { %2991 = vpow2.f32 %v2314_v10  ;;  %v2228_v62 = vmax.f32 %v4071_v7, 0.0  ;;  %v2230_v51 = vmax.f32 %v4074_v29, 0.0  ;;  %v2229_v3 = vmax.f32 %v4088_v9, 0.0 }
 0x375   : > { %2993 = vpow2.f32 %v2318_v26  ;;  %v4149_v1 = vsub.s32 3, %v2609_v28  ;;  %v2231_v56 = vmax.f32 %v4097_v63, 0.0 }
 0x376   : > { %2995 = vtanh.f32 %v2513_v41 }
 0x377   : > { %2997 = vtanh.f32 %v2515_v4 }
 0x378   : > { %2999 = vrcp.f32 %v2176_v37 }
 0x379   : > { %v4126_v27 = vpop.eup %2983  ;;  %3001 = vrcp.f32 %v2178_v31 }
 0x37a   : > { %v4128_v48 = vpop.eup %2985  ;;  %v2372_v54 = vadd.f32 1.0, %v4126_v27  ;;  %3003 = vrcp.f32 %v2177_v50  ;;  %v2375_v49 = vmul.f32 -0.5, %v4126_v27  ;;  %v2378_v2 = vand.u32 2147483647, %v4126_v27 }
 0x37b   : > { %v2390_v0 = vadd.f32 1.0, %v4128_v48  ;;  %v2393_v53 = vmul.f32 -0.5, %v4128_v48  ;;  %v2396_v5 = vand.u32 2147483647, %v4128_v48 }
 0x37c   : > { %3005 = vlog2.f32 %v2372_v54  ;;  %v2376_v44 = vadd.f32 1.0, %v2375_v49  ;;  %vm4180_vm12 = vcmp.lt.f32.partialorder %v2378_v2, 0.0004427343 }
 0x37d   : > { %3007 = vlog2.f32 %v2390_v0  ;;  %v2394_v36 = vadd.f32 1.0, %v2393_v53  ;;  %vm4190_vm13 = vcmp.lt.f32.partialorder %v2396_v5, 0.0004427343 }
 0x37e   : > { %3009 = vrcp.f32 %v2179_v18  ;;  %v2377_v26 = vmul.f32 %v4126_v27, %v2376_v44 }
 0x37f   : > { %v4135_v42 = vpop.eup %2987  ;;  %3011 = vpow2.f32 %v2883_v59  ;;  %v2395_v34 = vmul.f32 %v4128_v48, %v2394_v36 }
 0x380   : > { %v4137_v22 = vpop.eup %2989  ;;  %v2560_v14 = vadd.f32 1.0, %v4135_v42  ;;  %3013 = vpow2.f32 %v2885_v20  ;;  %v2544_v27 = vmul.f32 2.0, %v4135_v42 }
 0x381   : > { %v4140_v8 = vpop.eup %2991  ;;  %v2562_v15 = vadd.f32 1.0, %v4137_v22  ;;  %3015 = vpow2.f32 %v2884_v25  ;;  %v2546_v20 = vmul.f32 2.0, %v4137_v22 }
 0x382   : > { %v4145_v35 = vpop.eup %2993  ;;  %3017 = vrcp.f32 %v2560_v14  ;;  %v2381_v13 = vadd.f32 1.0, %v4140_v8  ;;  %v2384_v10 = vmul.f32 -0.5, %v4140_v8  ;;  %v2387_v4 = vand.u32 2147483647, %v4140_v8 }
 0x383   : > { %3019 = vrcp.f32 %v2562_v15  ;;  %v2399_v57 = vadd.f32 1.0, %v4145_v35  ;;  %v1998_v55 = vpop.f32.mrf.mxu1  ;;  %v2039_v43 = vpop.f32.mrf.mxu0  ;;  %v2402_v19 = vmul.f32 -0.5, %v4145_v35  ;;  %v2405_v28 = vand.u32 2147483647, %v4145_v35 }
 0x384   : > { %v4153_v16 = vpop.eup %2995  ;;  %3021 = vlog2.f32 %v2381_v13  ;;  %v4158_v60 = vadd.f32 %v1998_v55, %v4036_v40  ;;  %v4186_v30 = vadd.f32 %v2039_v43, %v4036_v40  ;;  %v2385_v23 = vadd.f32 1.0, %v2384_v10 }
 0x385   : > { %v4160_v46 = vpop.eup %2997  ;;  %v2561_v17 = vadd.f32 1.0, %v4153_v16  ;;  %3023 = vlog2.f32 %v2399_v57  ;;  %v2000_v61 = vpop.f32.mrf.mxu1  ;;  %v2403_v53 = vadd.f32 1.0, %v2402_v19  ;;  %vm4217_vm15 = vcmp.lt.f32.partialorder %v2387_v4, 0.0004427343 }
 0x386   : > { %v4163_v11 = vpop.f32.mrf.mxu0  ;;  %v4165_v38 = vpop.eup %2999  ;;  %v2563_v6 = vadd.f32 1.0, %v4160_v46  ;;  %3025 = vpow2.f32 %v2886_v58  ;;  %v2280_v39 = vand.u32 2147483647, %v4158_v60  ;;  %v4197_v18 = vadd.f32 %v2000_v61, %v4036_v40 }
 0x387   : > { %v4171_v45 = vpop.eup %3001  ;;  %3027 = vrcp.f32 %v2561_v17  ;;  %v2002_v21 = vpop.f32.mrf.mxu1  ;;  %v2282_v59 = vand.u32 2147483647, %v4186_v30  ;;  %v2386_v5 = vmul.f32 %v4140_v8, %v2385_v23  ;;  %vm2406_vm1 = vcmp.lt.f32.partialorder %v2405_v28, 0.0004427343 }
 0x388   : > { %v2043_v24 = vpop.f32.mrf.mxu0  ;;  %v4178_v52 = vpop.eup %3003  ;;  %3029 = vrcp.f32 %v2563_v6  ;;  %v2296_v50 = vsub.f32 0.0, %v2280_v39  ;;  %v2281_v55 = vand.u32 2147483647, %v4197_v18  ;;  %vm2248_vm2 = vcmp.ne.f32.partialorder %v4158_v60, %v4158_v60 }
 0x389   : > { %v3006_v12 = vpop.eup %3005  ;;  %v2003_v37 = vpop.f32.mrf.mxu1  ;;  %v2298_v13 = vsub.f32 0.0, %v2282_v59  ;;  %vm2250_vm4 = vcmp.ne.f32.partialorder %v4186_v30, %v4186_v30  ;;  %vm2249_vm7 = vcmp.ne.f32.partialorder %v4197_v18, %v4197_v18 }
 0x38a   : > { %v2044_v41 = vpop.f32.mrf.mxu0  ;;  %v3008_v33 = vpop.eup %3007  ;;  %v2374_v31 = vmul.f32 0.6931472, %v3006_v12  ;;  %v2320_v14 = vmul.f32 1.442695, %v2296_v50  ;;  %v2547_v37 = vmul.f32 2.0, %v4160_v46 }
 0x38b   : > { %v4199_v54 = vpop.eup %3009  ;;  %v2392_v48 = vmul.f32 0.6931472, %v3008_v33  ;;  %v2324_v17 = vmul.f32 1.442695, %v2298_v13 }
 0x38c   : > { %v4203_v0 = vpop.eup %3011  ;;  %v2380_v25 = vsel %vm4180_vm12, %v2377_v26, %v2374_v31  ;;  %3031 = vpow2.f32 %v2320_v14 }
 0x38d   : > { %v4209_v15 = vpop.eup %3013  ;;  %v2484_v49 = vadd.f32 %v2380_v25, %v2228_v62  ;;  %v2398_v42 = vsel %vm4190_vm13, %v2395_v34, %v2392_v48  ;;  %v2545_v62 = vmul.f32 2.0, %v4153_v16  ;;  %v2297_v16 = vsub.f32 0.0, %v2281_v55 }
 0x38e   : > { %v4213_v58 = vpop.eup %3015  ;;  %v2486_v57 = vadd.f32 %v2398_v42, %v2230_v51  ;;  %3033 = vpow2.f32 %v2324_v17  ;;  %v4253_v25 = vadd.f32 %v4163_v11, %v4036_v40  ;;  %v2180_v13 = vadd.f32 1.0, %v4203_v0 }
 0x38f   : > { %v3018_v43 = vpop.eup %3017  ;;  %v2500_v2 = vsel %vm2244_vm10, %v4071_v7, %v2484_v49  ;;  %v2404_v7 = vmul.f32 %v4145_v35, %v2403_v53  ;;  %v2322_v32 = vmul.f32 1.442695, %v2297_v16 }
 0x390   : > { %v3020_v44 = vpop.eup %3019  ;;  %v2592_v36 = vmul.f32 %v3018_v43, %v2544_v27  ;;  %v2516_v61 = vmul.f32 0.13571429, %v2500_v2  ;;  %v2502_v6 = vsel %vm2246_vm11, %v4074_v29, %v2486_v57  ;;  %v2283_v57 = vand.u32 2147483647, %v4253_v25 }
 0x391   : > { %v3022_v51 = vpop.eup %3021  ;;  %v2594_v10 = vmul.f32 %v3020_v44, %v2546_v20  ;;  %v2518_v21 = vmul.f32 0.13571429, %v2502_v6  ;;  %vm2251_vm9 = vcmp.ne.f32.partialorder %v4253_v25, %v4253_v25 }
 0x392   : > { %v3024_v8 = vpop.eup %3023  ;;  %v2611_v24 = vrot.slane %v2592_v36, %v4149_v1  ;;  %v2620_v47 = vsub.f32 1.0, %v2592_v36  ;;  %3035 = vtanh.f32 %v2516_v61  ;;  %v2383_v39 = vmul.f32 0.6931472, %v3022_v51 }
 0x393   : > { %v3026_v12 = vpop.eup %3025  ;;  %v2636_v26 = vsub.f32 1.0, %v2594_v10  ;;  %3037 = vtanh.f32 %v2518_v21  ;;  %v2401_v34 = vmul.f32 0.6931472, %v3024_v8  ;;  %v2181_v36 = vadd.f32 1.0, %v4213_v58 }
 0x394   : > { %v3028_v19 = vpop.eup %3027  ;;  %v2622_v29 = vmul.f32 %v2620_v47, %v2594_v10  ;;  %v2389_v41 = vsel %vm4217_vm15, %v2386_v5, %v2383_v39  ;;  %3039 = vpow2.f32 %v2322_v32  ;;  %v2616_v46 = vmul.f32 %v4165_v38, %v2611_v24 }
 0x395   : > { %v3030_v35 = vpop.eup %3029  ;;  %v2593_v33 = vmul.f32 %v3028_v19, %v2545_v62  ;;  %v4239_v31 = vmul.f32 %v2636_v26, %v2620_v47  ;;  %v2485_v4 = vadd.f32 %v2389_v41, %v2229_v3  ;;  %v2407_v50 = vsel %vm2406_vm1, %v2404_v7, %v2401_v34 }
 0x396   : > { %v2627_v27 = vrot.slane %v2622_v29, %v4149_v1  ;;  %v2595_v48 = vmul.f32 %v3030_v35, %v2547_v37  ;;  %v2487_v23 = vadd.f32 %v2407_v50, %v2231_v56  ;;  %v2299_v62 = vsub.f32 0.0, %v2283_v57 }
 0x397   : > { %v2621_v59 = vsub.f32 1.0, %v2593_v33  ;;  %v2501_v20 = vsel %vm2245_vm14, %v4088_v9, %v2485_v4  ;;  %v2615_v38 = vrot.slane %v2593_v33, %v4149_v1  ;;  %v2183_v6 = vadd.f32 1.0, %v3026_v12 }
 0x398   : > { %v2632_v3 = vmul.f32 %v4171_v45, %v2627_v27  ;;  %v2637_v28 = vsub.f32 1.0, %v2595_v48  ;;  %v2517_v14 = vmul.f32 0.13571429, %v2501_v20  ;;  %v2503_v56 = vsel %vm2247_vm0, %v4097_v63, %v2487_v23 }
 0x399   : > { %v2623_v49 = vmul.f32 %v2621_v59, %v2595_v48  ;;  %v2519_v42 = vmul.f32 0.13571429, %v2503_v56  ;;  %v4265_v11 = vpop.eup %3031  ;;  %v2182_v63 = vadd.f32 1.0, %v4209_v15  ;;  %v2617_v55 = vmul.f32 %v4178_v52, %v2615_v38 }
 0x39a   : > { %v4261_v53 = vadd.f32 %v2632_v3, %v2616_v46  ;;  %3041 = vtanh.f32 %v2517_v14  ;;  %v4263_v9 = vmul.f32 %v2637_v28, %v2621_v59  ;;  %v2408_v22 = vadd.f32 1.0, %v4265_v11 }
 0x39b   : > { %v2631_v45 = vrot.slane %v2623_v49, %v4149_v1  ;;  %3043 = vtanh.f32 %v2519_v42  ;;  %v4274_v2 = vpop.eup %3033  ;;  %v2887_v10 = vmul.f32 -1.442695, %v4158_v60  ;;  %v2411_v21 = vmul.f32 -0.5, %v4265_v11 }
 0x39c   : > { %3045 = vlog2.f32 %v2408_v22  ;;  %v2426_v0 = vadd.f32 1.0, %v4274_v2  ;;  %v2889_v8 = vmul.f32 -1.442695, %v4186_v30  ;;  %v2429_v26 = vmul.f32 -0.5, %v4274_v2 }
 0x39d   : > { %v2633_v43 = vmul.f32 %v4199_v54, %v2631_v45  ;;  %3047 = vrcp.f32 %v2180_v13  ;;  %v2326_v54 = vmul.f32 1.442695, %v2299_v62  ;;  %v2412_v41 = vadd.f32 1.0, %v2411_v21 }
 0x39e   : > { %3049 = vrcp.f32 %v2182_v63  ;;  %v2414_v33 = vand.u32 2147483647, %v4265_v11  ;;  %v2232_v48 = vmax.f32 %v4158_v60, 0.0  ;;  %v2234_v59 = vmax.f32 %v4186_v30, 0.0 }
 0x39f   : > { %v4276_v5 = vpop.eup %3035  ;;  %v4278_v17 = vadd.f32 %v2633_v43, %v2617_v55  ;;  %3051 = vlog2.f32 %v2426_v0  ;;  %v2430_v20 = vadd.f32 1.0, %v2429_v26  ;;  %v2413_v56 = vmul.f32 %v4265_v11, %v2412_v41 }
 0x3a0   : > { %v3038_v44 = vpop.eup %3037  ;;  %v2564_v15 = vadd.f32 1.0, %v4276_v5  ;;  %v2432_v38 = vand.u32 2147483647, %v4274_v2  ;;  %vm2415_vm3 = vcmp.lt.f32.partialorder %v2414_v33, 0.0004427343  ;;  %v2548_v57 = vmul.f32 2.0, %v4276_v5 }
 0x3a1   : > { %v2566_v52 = vadd.f32 1.0, %v3038_v44  ;;  %v4283_v61 = vpop.eup %3039  ;;  %v2550_v63 = vmul.f32 2.0, %v3038_v44  ;;  %v2431_v0 = vmul.f32 %v4274_v2, %v2430_v20 }
 0x3a2   : > { %3053 = vrcp.f32 %v2564_v15  ;;  %v2417_v7 = vadd.f32 1.0, %v4283_v61  ;;  %v2420_v45 = vmul.f32 -0.5, %v4283_v61  ;;  %v2423_v15 = vand.u32 2147483647, %v4283_v61 }
 0x3a3   : > { %3055 = vrcp.f32 %v2566_v52  ;;  %v2080_v16 = vpop.f32.mrf.mxu1  ;;  %v2121_v51 = vpop.f32.mrf.mxu0  ;;  %vm2433_vm5 = vcmp.lt.f32.partialorder %v2432_v38, 0.0004427343 }
 0x3a4   : > { %3057 = vrcp.f32 %v2181_v36  ;;  %v4290_v58 = vadd.f32 %v2080_v16, %v4036_v40  ;;  %v4297_v39 = vadd.f32 %v2121_v51, %v4036_v40  ;;  %v2421_v51 = vadd.f32 1.0, %v2420_v45 }
 0x3a5   : > { %3059 = vpow2.f32 %v2326_v54  ;;  %v4292_v24 = vpop.f32.mrf.mxu1  ;;  %v4294_v47 = vpop.f32.mrf.mxu0  ;;  %v2233_v54 = vmax.f32 %v4197_v18, 0.0  ;;  %vm4331_vm6 = vcmp.lt.f32.partialorder %v2423_v15, 0.0004427343 }
 0x3a6   : > { %3061 = vlog2.f32 %v2417_v7  ;;  %v2284_v34 = vand.u32 2147483647, %v4290_v58  ;;  %v2286_v23 = vand.u32 2147483647, %v4297_v39  ;;  %vm2252_vm11 = vcmp.ne.f32.partialorder %v4290_v58, %v4290_v58 }
 0x3a7   : > { %v4299_v12 = vpop.eup %3041  ;;  %3063 = vrcp.f32 %v2183_v6  ;;  %v2084_v32 = vpop.f32.mrf.mxu1  ;;  %vm2254_vm13 = vcmp.ne.f32.partialorder %v4297_v39, %v4297_v39 }
 0x3a8   : > { %v2125_v19 = vpop.f32.mrf.mxu0  ;;  %v4303_v29 = vpop.eup %3043  ;;  %v2565_v37 = vadd.f32 1.0, %v4299_v12  ;;  %3065 = vpow2.f32 %v2887_v10  ;;  %v2300_v4 = vsub.f32 0.0, %v2284_v34  ;;  %v2302_v49 = vsub.f32 0.0, %v2286_v23 }
 0x3a9   : > { %v2567_v35 = vadd.f32 1.0, %v4303_v29  ;;  %3067 = vpow2.f32 %v2889_v8  ;;  %v2085_v50 = vpop.f32.mrf.mxu1  ;;  %v3046_v46 = vpop.eup %3045 }
 0x3aa   : > { %v2126_v27 = vpop.f32.mrf.mxu0  ;;  %3069 = vrcp.f32 %v2565_v37  ;;  %v2328_v3 = vmul.f32 1.442695, %v2300_v4  ;;  %v3048_v28 = vpop.eup %3047  ;;  %v2410_v14 = vmul.f32 0.6931472, %v3046_v46  ;;  %v2332_v55 = vmul.f32 1.442695, %v2302_v49 }
 0x3ab   : > { %3071 = vrcp.f32 %v2567_v35  ;;  %v4315_v42 = vpop.eup %3049 }
 0x3ac   : > { %3073 = vpow2.f32 %v2328_v3  ;;  %v3052_v13 = vpop.eup %3051  ;;  %v2416_v22 = vsel %vm2415_vm3, %v2413_v56, %v2410_v14  ;;  %v2551_v3 = vmul.f32 2.0, %v4303_v29  ;;  %v4364_v29 = vadd.f32 %v4294_v47, %v4036_v40 }
 0x3ad   : > { %v2488_v11 = vadd.f32 %v2416_v22, %v2232_v48  ;;  %v2428_v62 = vmul.f32 0.6931472, %v3052_v13  ;;  %3075 = vpow2.f32 %v2332_v55  ;;  %v2422_v48 = vmul.f32 %v4283_v61, %v2421_v51 }
 0x3ae   : > { %v2888_v22 = vmul.f32 -1.442695, %v4197_v18  ;;  %vm2255_vm1 = vcmp.ne.f32.partialorder %v4364_v29, %v4364_v29 }
 0x3af   : > { %v3054_v43 = vpop.eup %3053  ;;  %v2504_v5 = vsel %vm2248_vm2, %v4158_v60, %v2488_v11  ;;  %v2434_v44 = vsel %vm2433_vm5, %v2431_v0, %v2428_v62  ;;  %v4338_v60 = vadd.f32 %v4292_v24, %v4036_v40 }
 0x3b0   : > { %v3056_v36 = vpop.eup %3055  ;;  %v2596_v52 = vmul.f32 %v3054_v43, %v2548_v57  ;;  %v2520_v7 = vmul.f32 0.13571429, %v2504_v5  ;;  %v2490_v8 = vadd.f32 %v2434_v44, %v2234_v59  ;;  %v2549_v59 = vmul.f32 2.0, %v4299_v12 }
 0x3b1   : > { %v3058_v6 = vpop.eup %3057  ;;  %v2598_v16 = vmul.f32 %v3056_v36, %v2550_v63  ;;  %v2285_v12 = vand.u32 2147483647, %v4338_v60  ;;  %v2287_v36 = vand.u32 2147483647, %v4364_v29  ;;  %vm2253_vm15 = vcmp.ne.f32.partialorder %v4338_v60, %v4338_v60 }
 0x3b2   : > { %v4328_v10 = vpop.eup %3059  ;;  %v2640_v2 = vmul.f32 %v4239_v31, %v2596_v52  ;;  %v2654_v21 = vsub.f32 1.0, %v2596_v52  ;;  %3077 = vtanh.f32 %v2520_v7  ;;  %v2506_v33 = vsel %vm2250_vm4, %v4186_v30, %v2490_v8 }
 0x3b3   : > { %v3062_v26 = vpop.eup %3061  ;;  %v2672_v34 = vsub.f32 1.0, %v2598_v16  ;;  %v2435_v19 = vadd.f32 1.0, %v4328_v10  ;;  %v2522_v50 = vmul.f32 0.13571429, %v2506_v33  ;;  %v2438_v43 = vmul.f32 -0.5, %v4328_v10 }
 0x3b4   : > { %v3064_v37 = vpop.eup %3063  ;;  %v2645_v41 = vrot.slane %v2640_v2, %v4149_v1  ;;  %v2656_v35 = vmul.f32 %v2654_v21, %v4239_v31  ;;  %v2419_v27 = vmul.f32 0.6931472, %v3062_v26  ;;  %v2301_v15 = vsub.f32 0.0, %v2285_v12 }
 0x3b5   : > { %v4346_v4 = vpop.eup %3065  ;;  %3079 = vlog2.f32 %v2435_v19  ;;  %v2441_v5 = vand.u32 2147483647, %v4328_v10  ;;  %v2303_v7 = vsub.f32 0.0, %v2287_v36  ;;  %v2236_v12 = vmax.f32 %v4290_v58, 0.0 }
 0x3b6   : > { %v4349_v24 = vpop.eup %3067  ;;  %v2650_v23 = vmul.f32 %v3048_v28, %v2645_v41  ;;  %v2658_v46 = vmul.f32 %v2656_v35, %v2598_v16  ;;  %v4352_v31 = vmul.f32 %v2672_v34, %v2656_v35  ;;  %3081 = vtanh.f32 %v2522_v50 }
 0x3b7   : > { %v3070_v20 = vpop.eup %3069  ;;  %v2425_v30 = vsel %vm4331_vm6, %v2422_v48, %v2419_v27  ;;  %v2439_v16 = vadd.f32 1.0, %v2438_v43  ;;  %v2330_v21 = vmul.f32 1.442695, %v2301_v15  ;;  %v2235_v34 = vmax.f32 %v4253_v25, 0.0 }
 0x3b8   : > { %v3072_v14 = vpop.eup %3071  ;;  %v2652_v56 = vadd.f32 %v2650_v23, %v4261_v53  ;;  %v2663_v61 = vrot.slane %v2658_v46, %v4149_v1  ;;  %v2597_v38 = vmul.f32 %v3070_v20, %v2549_v59  ;;  %v2489_v49 = vadd.f32 %v2425_v30, %v2233_v54 }
 0x3b9   : > { %v2599_v28 = vmul.f32 %v3072_v14, %v2551_v3  ;;  %v4366_v45 = vpop.eup %3073  ;;  %v2440_v19 = vmul.f32 %v4328_v10, %v2439_v16  ;;  %vm2442_vm8 = vcmp.lt.f32.partialorder %v2441_v5, 0.0004427343  ;;  %v2334_v33 = vmul.f32 1.442695, %v2303_v7 }
 0x3ba   : > { %v2668_v13 = vmul.f32 %v4315_v42, %v2663_v61  ;;  %v2641_v53 = vmul.f32 %v4263_v9, %v2597_v38  ;;  %v2655_v57 = vsub.f32 1.0, %v2597_v38  ;;  %v2505_v63 = vsel %vm2249_vm7, %v4197_v18, %v2489_v49  ;;  %v4378_v42 = vpop.eup %3075 }
 0x3bb   : > { %v2521_v55 = vmul.f32 0.13571429, %v2505_v63  ;;  %v2444_v11 = vadd.f32 1.0, %v4366_v45  ;;  %v2673_v0 = vsub.f32 1.0, %v2599_v28  ;;  %v2462_v44 = vadd.f32 1.0, %v4378_v42 }
 0x3bc   : > { %v4374_v62 = vadd.f32 %v2668_v13, %v2652_v56  ;;  %v2649_v40 = vrot.slane %v2641_v53, %v4149_v1  ;;  %v2657_v47 = vmul.f32 %v2655_v57, %v4263_v9  ;;  %v2184_v48 = vadd.f32 1.0, %v4346_v4 }
 0x3bd   : > { %3083 = vtanh.f32 %v2521_v55  ;;  %v2465_v10 = vmul.f32 -0.5, %v4378_v42  ;;  %v2890_v23 = vmul.f32 -1.442695, %v4253_v25  ;;  %v2450_v3 = vand.u32 2147483647, %v4366_v45 }
 0x3be   : > { %v2651_v52 = vmul.f32 %v3058_v6, %v2649_v40  ;;  %v2659_v18 = vmul.f32 %v2657_v47, %v2599_v28  ;;  %v4381_v54 = vmul.f32 %v2673_v0, %v2657_v47  ;;  %3085 = vlog2.f32 %v2444_v11 }
 0x3bf   : > { %3087 = vpow2.f32 %v2888_v22  ;;  %v3078_v2 = vpop.eup %3077  ;;  %v2186_v4 = vadd.f32 1.0, %v4349_v24  ;;  %v2466_v61 = vadd.f32 1.0, %v2465_v10  ;;  %vm2451_vm10 = vcmp.lt.f32.partialorder %v2450_v3, 0.0004427343 }
 0x3c0   : > { %v2653_v9 = vadd.f32 %v2651_v52, %v4278_v17  ;;  %v2667_v51 = vrot.slane %v2659_v18, %v4149_v1  ;;  %3089 = vlog2.f32 %v2462_v44  ;;  %v2568_v26 = vadd.f32 1.0, %v3078_v2 }
 0x3c1   : > { %v2447_v17 = vmul.f32 -0.5, %v4366_v45  ;;  %v2467_v22 = vmul.f32 %v4378_v42, %v2466_v61  ;;  %v2552_v55 = vmul.f32 2.0, %v3078_v2  ;;  %v2891_v15 = vmul.f32 -1.442695, %v4290_v58 }
 0x3c2   : > { %v3080_v8 = vpop.eup %3079  ;;  %v2669_v6 = vmul.f32 %v3064_v37, %v2667_v51  ;;  %3091 = vrcp.f32 %v2568_v26 }
 0x3c3   : > { %v2437_v32 = vmul.f32 0.6931472, %v3080_v8  ;;  %v3082_v41 = vpop.eup %3081  ;;  %3093 = vpow2.f32 %v2330_v21  ;;  %v2448_v59 = vadd.f32 1.0, %v2447_v17 }
 0x3c4   : > { %v4389_v35 = vadd.f32 %v2669_v6, %v2653_v9  ;;  %v2570_v50 = vadd.f32 1.0, %v3082_v41  ;;  %v2554_v18 = vmul.f32 2.0, %v3082_v41 }
 0x3c5   : > { %v2443_v27 = vsel %vm2442_vm8, %v2440_v19, %v2437_v32  ;;  %v2449_v28 = vmul.f32 %v4366_v45, %v2448_v59  ;;  %v2238_v45 = vmax.f32 %v4297_v39, 0.0 }
 0x3c6   : > { %v2491_v37 = vadd.f32 %v2443_v27, %v2235_v34  ;;  %3095 = vrcp.f32 %v2570_v50 }
 0x3c7   : > { %3097 = vpow2.f32 %v2334_v33 }
 0x3c8   : > { %v2507_v46 = vsel %vm2251_vm9, %v4253_v25, %v2491_v37  ;;  %3099 = vrcp.f32 %v2184_v48  ;;  %v2468_v25 = vand.u32 2147483647, %v4378_v42 }
 0x3c9   : > { %v2523_v20 = vmul.f32 0.13571429, %v2507_v46 }
 0x3ca   : > { %v3084_v30 = vpop.eup %3083  ;;  %vm2469_vm12 = vcmp.lt.f32.partialorder %v2468_v25, 0.0004427343 }
 0x3cb   : > { %v3086_v14 = vpop.eup %3085  ;;  %v2569_v56 = vadd.f32 1.0, %v3084_v30  ;;  %3101 = vtanh.f32 %v2523_v20  ;;  %v2553_v41 = vmul.f32 2.0, %v3084_v30 }
 0x3cc   : > { %v3088_v38 = vpop.eup %3087  ;;  %3103 = vpow2.f32 %v2890_v23  ;;  %v2446_v49 = vmul.f32 0.6931472, %v3086_v14 }
 0x3cd   : > { %3105 = vrcp.f32 %v2569_v56  ;;  %v3090_v13 = vpop.eup %3089  ;;  %v2185_v57 = vadd.f32 1.0, %v3088_v38 }
 0x3ce   : > { %3107 = vrcp.f32 %v2186_v4  ;;  %v2452_v53 = vsel %vm2451_vm10, %v2449_v28, %v2446_v49  ;;  %v2464_v63 = vmul.f32 0.6931472, %v3090_v13 }
 0x3cf   : > { %v2492_v24 = vadd.f32 %v2452_v53, %v2236_v12  ;;  %v3092_v43 = vpop.eup %3091  ;;  %3109 = vrcp.f32 %v2185_v57 }
 0x3d0   : > { %v2470_v40 = vsel %vm2469_vm12, %v2467_v22, %v2464_v63  ;;  %v4408_v47 = vpop.eup %3093  ;;  %v2600_v0 = vmul.f32 %v3092_v43, %v2552_v55 }
 0x3d1   : > { %v2508_v11 = vsel %vm2252_vm11, %v4290_v58, %v2492_v24  ;;  %v2494_v52 = vadd.f32 %v2470_v40, %v2238_v45  ;;  %v2453_v42 = vadd.f32 1.0, %v4408_v47  ;;  %v2893_v58 = vmul.f32 -1.442695, %v4297_v39 }
 0x3d2   : > { %v2524_v36 = vmul.f32 0.13571429, %v2508_v11  ;;  %v2676_v5 = vmul.f32 %v4352_v31, %v2600_v0  ;;  %v2690_v44 = vsub.f32 1.0, %v2600_v0  ;;  %v2456_v27 = vmul.f32 -0.5, %v4408_v47 }
 0x3d3   : > { %v3096_v16 = vpop.eup %3095  ;;  %v2510_v9 = vsel %vm2254_vm13, %v4297_v39, %v2494_v52  ;;  %v2459_v4 = vand.u32 2147483647, %v4408_v47  ;;  %v2237_v24 = vmax.f32 %v4338_v60, 0.0 }
 0x3d4   : > { %3111 = vtanh.f32 %v2524_v36  ;;  %v4416_v51 = vpop.eup %3097  ;;  %v2526_v2 = vmul.f32 0.13571429, %v2510_v9  ;;  %v2681_v21 = vrot.slane %v2676_v5, %v4149_v1  ;;  %v4420_v7 = vmul.f32 %v3096_v16, %v2554_v18 }
 0x3d5   : > { %3113 = vlog2.f32 %v2453_v42  ;;  %v4423_v8 = vmul.f32 %v2690_v44, %v4352_v31  ;;  %v3100_v6 = vpop.eup %3099  ;;  %v2471_v26 = vadd.f32 1.0, %v4416_v51  ;;  %v2457_v20 = vadd.f32 1.0, %v2456_v27 }
 0x3d6   : > { %3115 = vpow2.f32 %v2891_v15  ;;  %v2686_v32 = vmul.f32 %v3100_v6, %v2681_v21  ;;  %v2474_v30 = vmul.f32 -0.5, %v4416_v51  ;;  %vm2460_vm14 = vcmp.lt.f32.partialorder %v2459_v4, 0.0004427343 }
 0x3d7   : > { %3117 = vtanh.f32 %v2526_v2  ;;  %v2694_v19 = vmul.f32 %v4423_v8, %v4420_v7  ;;  %v2458_v49 = vmul.f32 %v4408_v47, %v2457_v20  ;;  %v2477_v63 = vand.u32 2147483647, %v4416_v51 }
 0x3d8   : > { %v3102_v34 = vpop.eup %3101  ;;  %3119 = vlog2.f32 %v2471_v26  ;;  %v2688_v50 = vadd.f32 %v2686_v32, %v4374_v62  ;;  %v2475_v53 = vadd.f32 1.0, %v2474_v30  ;;  %v2239_v18 = vmax.f32 %v4364_v29, 0.0 }
 0x3d9   : > { %v3104_v39 = vpop.eup %3103  ;;  %v2571_v17 = vadd.f32 1.0, %v3102_v34  ;;  %v2699_v31 = vrot.slane %v2694_v19, %v4149_v1  ;;  %3121 = vpow2.f32 %v2893_v58  ;;  %v2555_v43 = vmul.f32 2.0, %v3102_v34 }
 0x3da   : > { %v3106_v33 = vpop.eup %3105  ;;  %v2187_v46 = vadd.f32 1.0, %v3104_v39  ;;  %v2476_v15 = vmul.f32 %v4416_v51, %v2475_v53  ;;  %vm2478_vm0 = vcmp.lt.f32.partialorder %v2477_v63, 0.0004427343  ;;  %v2892_v16 = vmul.f32 -1.442695, %v4338_v60 }
 0x3db   : > { %v3108_v48 = vpop.eup %3107  ;;  %v2601_v37 = vmul.f32 %v3106_v33, %v2553_v41  ;;  %3123 = vrcp.f32 %v2571_v17  ;;  %v2894_v21 = vmul.f32 -1.442695, %v4364_v29  ;;  %v2708_v34 = vsub.f32 1.0, %v4420_v7 }
 0x3dc   : > { %v2704_v10 = vmul.f32 %v3108_v48, %v2699_v31  ;;  %v3110_v62 = vpop.eup %3109  ;;  %3125 = vrcp.f32 %v2187_v46 }
 0x3dd   : > { %v2677_v23 = vmul.f32 %v4381_v54, %v2601_v37  ;;  %v2691_v12 = vsub.f32 1.0, %v2601_v37  ;;  %v2710_v17 = vmul.f32 %v2708_v34, %v4423_v8 }
 0x3de   : > { %v4432_v59 = vadd.f32 %v2704_v10, %v2688_v50 }
 0x3df   : > { %v2685_v3 = vrot.slane %v2677_v23, %v4149_v1  ;;  %v4444_v47 = vmul.f32 %v2691_v12, %v4381_v54 }
 0x3e1   : > { %v3112_v14 = vpop.eup %3111  ;;  %v2687_v56 = vmul.f32 %v3110_v62, %v2685_v3 }
 0x3e2   : > { %v3114_v61 = vpop.eup %3113  ;;  %v2572_v38 = vadd.f32 1.0, %v3112_v14  ;;  %v2556_v32 = vmul.f32 2.0, %v3112_v14 }
 0x3e3   : > { %v3116_v28 = vpop.eup %3115  ;;  %v2689_v25 = vadd.f32 %v2687_v56, %v4389_v35  ;;  %v2455_v13 = vmul.f32 0.6931472, %v3114_v61 }
 0x3e4   : > { %v3118_v57 = vpop.eup %3117  ;;  %3127 = vrcp.f32 %v2572_v38  ;;  %v2188_v11 = vadd.f32 1.0, %v3116_v28 }
 0x3e5   : > { %v2574_v22 = vadd.f32 1.0, %v3118_v57  ;;  %v2461_v55 = vsel %vm2460_vm14, %v2458_v49, %v2455_v13  ;;  %v3120_v45 = vpop.eup %3119  ;;  %v2558_v27 = vmul.f32 2.0, %v3118_v57 }
 0x3e6   : > { %v2493_v40 = vadd.f32 %v2461_v55, %v2237_v24  ;;  %v3122_v35 = vpop.eup %3121  ;;  %v2473_v0 = vmul.f32 0.6931472, %v3120_v45 }
 0x3e7   : > { %3129 = vrcp.f32 %v2574_v22  ;;  %v2190_v9 = vadd.f32 1.0, %v3122_v35 }
 0x3e8   : > { %v3124_v36 = vpop.eup %3123  ;;  %v2509_v52 = vsel %vm2253_vm15, %v4338_v60, %v2493_v40  ;;  %v2479_v44 = vsel %vm2478_vm0, %v2476_v15, %v2473_v0  ;;  %3131 = vrcp.f32 %v2188_v11 }
 0x3e9   : > { %v2603_v42 = vmul.f32 %v3124_v36, %v2555_v43  ;;  %v2525_v5 = vmul.f32 0.13571429, %v2509_v52  ;;  %v2495_v58 = vadd.f32 %v2479_v44, %v2239_v18  ;;  %v3126_v60 = vpop.eup %3125 }
 0x3eb   : > { %v2695_v54 = vmul.f32 %v4444_v47, %v2603_v42  ;;  %3133 = vtanh.f32 %v2525_v5  ;;  %v2511_v51 = vsel %vm2255_vm1, %v4364_v29, %v2495_v58 }
 0x3ec   : > { %3135 = vpow2.f32 %v2892_v16  ;;  %v2527_v6 = vmul.f32 0.13571429, %v2511_v51 }
 0x3ed   : > { %v2703_v2 = vrot.slane %v2695_v54, %v4149_v1  ;;  %3137 = vrcp.f32 %v2190_v9 }
 0x3ee   : > { %3139 = vtanh.f32 %v2527_v6 }
 0x3ef   : > { %v2705_v26 = vmul.f32 %v3126_v60, %v2703_v2  ;;  %3141 = vpow2.f32 %v2894_v21 }
 0x3f1   : > { %v3128_v19 = vpop.eup %3127  ;;  %v2707_v39 = vadd.f32 %v2705_v26, %v2689_v25  ;;  %v2709_v25 = vsub.f32 1.0, %v2603_v42 }
 0x3f2   : > { %v2604_v41 = vmul.f32 %v3128_v19, %v2556_v32 }
 0x3f4   : > { %v3130_v33 = vpop.eup %3129  ;;  %v2712_v50 = vmul.f32 %v2710_v17, %v2604_v41  ;;  %v2726_v31 = vsub.f32 1.0, %v2604_v41 }
 0x3f5   : > { %v2606_v48 = vmul.f32 %v3130_v33, %v2558_v27  ;;  %v3132_v10 = vpop.eup %3131 }
 0x3f6   : > { %v2717_v29 = vrot.slane %v2712_v50, %v4149_v1  ;;  %v2728_v37 = vmul.f32 %v2726_v31, %v2710_v17 }
 0x3f8   : > { %v3134_v23 = vpop.eup %3133  ;;  %v2722_v46 = vmul.f32 %v3132_v10, %v2717_v29  ;;  %v2730_v20 = vmul.f32 %v2728_v37, %v2606_v48 }
 0x3f9   : > { %v2573_v7 = vadd.f32 1.0, %v3134_v23  ;;  %v3136_v3 = vpop.eup %3135  ;;  %v2557_v12 = vmul.f32 2.0, %v3134_v23 }
 0x3fa   : > { %v2724_v30 = vadd.f32 %v2722_v46, %v4432_v59  ;;  %v2735_v62 = vrot.slane %v2730_v20, %v4149_v1  ;;  %v3138_v4 = vpop.eup %3137  ;;  %v2189_v56 = vadd.f32 1.0, %v3136_v3  ;;  %v2711_v59 = vmul.f32 %v2709_v25, %v4444_v47 }
 0x3fb   : > { %3143 = vrcp.f32 %v2573_v7  ;;  %v3140_v8 = vpop.eup %3139 }
 0x3fc   : > { %v2740_v14 = vmul.f32 %v3138_v4, %v2735_v62  ;;  %v2575_v61 = vadd.f32 1.0, %v3140_v8  ;;  %v3142_v38 = vpop.eup %3141  ;;  %v2559_v63 = vmul.f32 2.0, %v3140_v8 }
 0x3fd   : > { %v2191_v28 = vadd.f32 1.0, %v3142_v38 }
 0x3fe   : > { %v2742_v49 = vadd.f32 %v2740_v14, %v2724_v30  ;;  %3145 = vrcp.f32 %v2575_v61 }
 0x3ff   : > { %3147 = vrcp.f32 %v2189_v56 }
 0x400   : > { %3149 = vrcp.f32 %v2191_v28 }
 0x408   : > { %v3144_v13 = vpop.eup %3143 }
 0x409   : > { %v2605_v53 = vmul.f32 %v3144_v13, %v2557_v12 }
 0x40b   : > { %v2713_v57 = vmul.f32 %v2711_v59, %v2605_v53  ;;  %v2727_v24 = vsub.f32 1.0, %v2605_v53  ;;  %v3146_v22 = vpop.eup %3145 }
 0x40c   : > { %v2607_v45 = vmul.f32 %v3146_v22, %v2559_v63  ;;  %v3148_v11 = vpop.eup %3147 }
 0x40d   : > { %v2721_v55 = vrot.slane %v2713_v57, %v4149_v1  ;;  %v2729_v43 = vmul.f32 %v2727_v24, %v2711_v59  ;;  %v3150_v36 = vpop.eup %3149 }
 0x40f   : > { %v2723_v40 = vmul.f32 %v3148_v11, %v2721_v55  ;;  %v2731_v35 = vmul.f32 %v2729_v43, %v2607_v45 }
 0x411   : > { %v2725_v0 = vadd.f32 %v2723_v40, %v2707_v39  ;;  %v2739_v15 = vrot.slane %v2731_v35, %v4149_v1 }
 0x413   : > { %v2741_v52 = vmul.f32 %v3150_v36, %v2739_v15 }
 0x415   : > { %v2743_v18 = vadd.f32 %v2741_v52, %v2725_v0 }
 0x417   : > { %v2746_v47 = vcombine.low %v2742_v49, %v2743_v18 }
 0x419   : > { %2748 = vst [vmem:[%s293_s20] sm:$0x77] %v2746_v47 }
 0x41a PF: > { %s18_s24 = sadd.s32 1, %s3187_s24  }
 0x41b   : > { %p15_p1 = scmp.ge.s32.totalorder %s18_s24, 4  }
 0x41d   :  { %17 = sbr.rel (!%p15_p1) target bundleno = 1 (0x1), region = 83 }
 0x422   :  { %2770 = vsyncpa [#allocation3], 1 }
 0x423   :  { %2772 = vsyncpa [#allocation3 + $0x1], 1 }

</bundles_post_ra>
